<compile_context>
chip_gen: v7x
topology: tpu7x:2x2x1
jax: 0.10.0
libtpu: 0.0.40
codegen_flags: <defaults>
</compile_context>

<pallas_src>
import numpy as np
import jax
import jax.numpy as jnp
from jax.experimental import pallas as pl
from jax.experimental.pallas import tpu as pltpu


# ----------------------------------------------------------------------------
# PE mask (mirror of sin_pe_func), computed host-side as a constant parameter.
# ----------------------------------------------------------------------------
def sin_pe_mask(pe_op, pe_t, pe_alpha, pe_ratio, n_hidden):
    indx = np.arange(n_hidden, dtype=np.float32) / float(n_hidden)
    mask = np.sin(2.0 * np.pi * indx * pe_t).astype(np.float32)
    if pe_op == "add":
        mask = pe_alpha * mask
    elif pe_op == "mul":
        mask = pe_alpha * mask + 1.0
    n = int(pe_ratio * n_hidden)
    if pe_op == "add":
        mask[n:] = 0.0
    elif pe_op == "mul":
        mask[n:] = 1.0
    return jnp.asarray(mask.reshape(1, -1))


def _round_up(x, m):
    return ((x + m - 1) // m) * m


def _cdiv(a, b):
    return -(-a // b)


# ----------------------------------------------------------------------------
# Pallas kernel: 4 MXU matmuls + fused (bias+PE) add + ReLU per batch tile.
# x arrives already in the weight dtype; accumulation is f32.
# ----------------------------------------------------------------------------
def _make_mlp_pe_kernel(return_intermediates):
    def kernel(x_ref, w0_ref, bpe0_ref, w1_ref, bpe1_ref,
               w2_ref, bpe2_ref, w3_ref, b3_ref, *out_refs):
        if return_intermediates:
            h1_ref, h2_ref, h3_ref, out_ref = out_refs
        else:
            h3_ref, out_ref = out_refs

        wdt = w0_ref.dtype

        # layer 0: Linear -> +(bias+PE) -> ReLU   (no input cast needed)
        h = jnp.dot(x_ref[...], w0_ref[...],
                    preferred_element_type=jnp.float32)
        h = jnp.maximum(h + bpe0_ref[...], 0.0)
        if return_intermediates:
            h1_ref[...] = h.astype(h1_ref.dtype)

        # layer 1
        h = jnp.dot(h.astype(wdt), w1_ref[...],
                    preferred_element_type=jnp.float32)
        h = jnp.maximum(h + bpe1_ref[...], 0.0)
        if return_intermediates:
            h2_ref[...] = h.astype(h2_ref.dtype)

        # layer 2
        h = jnp.dot(h.astype(wdt), w2_ref[...],
                    preferred_element_type=jnp.float32)
        h = jnp.maximum(h + bpe2_ref[...], 0.0)
        h3_ref[...] = h.astype(h3_ref.dtype)

        # layer 3: final Linear (lane-padded to 128 cols; no PE, no ReLU)
        out_ref[...] = (jnp.dot(h.astype(wdt), w3_ref[...],
                                preferred_element_type=jnp.float32)
                        + b3_ref[...]).astype(out_ref.dtype)
    return kernel


def mlp_pe_forward(x, params, pes, *, weight_dtype=jnp.bfloat16,
                   act_dtype=jnp.bfloat16, tb_max=512,
                   return_intermediates=True, single_buffer_weights=True):
    """Mirrors MLPPENet.forward (pe_op='add', pe_pos='bef_act').

    Returns (all_hs, hs0, hs).  If return_intermediates=False, all_hs is None
    and only hs0 / hs are produced (fewer output DMAs).
    """
    # TODO(synk): pe_op='mul' and pe_pos='aft_act' variants are not fused here
    # (module defaults only); shuffle() is a parameter-side permutation, not
    # part of the forward pass.
    # TODO(synk): weight_dtype=jnp.float8_e4m3fn is a latency option on v7x's
    # fp8 MXU but needs an accuracy check before use.
    w0, b0, w1, b1, w2, b2, w3, b3 = params
    pe0, pe1, pe2 = pes

    B = x.shape[0]
    F_in = int(np.prod(x.shape[1:]))
    H = w0.shape[1]
    C = w3.shape[1]

    # --- host-side constant folding & layout prep --------------------------
    # kernel-side x in the weight dtype (halves the input DMA); f32 flat view
    # is only materialized if all_hs is requested.
    xk = x.reshape(B, F_in).astype(weight_dtype)
    xf = x.reshape(B, F_in).astype(jnp.float32) if return_intermediates else None

    bpe0 = (b0 + pe0).astype(jnp.float32)
    bpe1 = (b1 + pe1).astype(jnp.float32)
    bpe2 = (b2 + pe2).astype(jnp.float32)

    w0c = w0.astype(weight_dtype)
    w1c = w1.astype(weight_dtype)
    w2c = w2.astype(weight_dtype)

    # lane-pad the classifier to a multiple of 128 (lane-dense MXU result &
    # unmasked stores); padded columns are zero and sliced off afterwards.
    C_pad = _round_up(max(C, 1), 128)
    w3p = jnp.zeros((H, C_pad), weight_dtype).at[:, :C].set(
        w3.astype(weight_dtype))
    b3p = jnp.zeros((1, C_pad), jnp.float32).at[:, :C].set(
        b3.astype(jnp.float32))

    wbytes = jnp.dtype(weight_dtype).itemsize
    abytes = jnp.dtype(act_dtype).itemsize

    # --- batch tile selection (no host padding; ragged last block is fine) --
    per_row_vmem = 2 * (F_in * wbytes
                        + (2 * H * abytes if return_intermediates else 0)
                        + H * 4 + C_pad * 4)          # double-buffered tiles
    act_budget = 10 * 1024 * 1024                     # conservative (v5e OK)
    tb_cap = max(8, min(tb_max, (act_budget // per_row_vmem) // 8 * 8))
    min_tiles = 2 if B > 8 else 1                     # >=2 steps -> v7x 2nd TC
    TB = max(8, min(tb_cap, _round_up(_cdiv(B, min_tiles), 8)))
    n_tiles = _cdiv(B, TB)
    TB = _round_up(_cdiv(B, n_tiles), 8)              # minimize last-tile waste
    grid = (_cdiv(B, TB),)

    # --- VMEM / cost bookkeeping --------------------------------------------
    weight_elems = F_in * H + 2 * H * H + H * C_pad
    wbuf = 1 if single_buffer_weights else 2
    vmem_est = (wbuf * weight_elems * wbytes
                + wbuf * (3 * H + C_pad) * 4
                + TB * per_row_vmem
                + (2 << 20))                          # slack for temporaries
    compiler_kwargs = dict(dimension_semantics=("parallel",))
    if vmem_est > 16 * 1024 * 1024:
        # keep portable across v5e/v6e/v7x scoped-VMEM defaults; for much
        # larger H a K-tiled "arbitrary" axis should replace resident weights.
        compiler_kwargs["vmem_limit_bytes"] = min(int(vmem_est * 1.25),
                                                  96 * 1024 * 1024)

    out_bytes = B * ((2 * H * abytes if return_intermediates else 0)
                     + H * 4 + C_pad * 4)
    cost = pl.CostEstimate(
        flops=2 * B * (F_in * H + 2 * H * H + H * C_pad),
        transcendentals=0,
        bytes_accessed=(B * F_in * wbytes + weight_elems * wbytes
                        + (3 * H + C_pad) * 4 + out_bytes))

    # --- specs + call --------------------------------------------------------
    def run(single_buffer):
        def batch_spec(cols):
            return pl.BlockSpec((TB, cols), lambda i: (i, 0))

        if single_buffer:
            # block index never changes -> no benefit from double buffering.
            def resident_spec(shape):
                return pl.BlockSpec(shape, lambda i: (0, 0),
                                    pipeline_mode=pl.Buffered(1))
        else:
            def resident_spec(shape):
                return pl.BlockSpec(shape, lambda i: (0, 0))

        in_specs = [
            batch_spec(F_in),                                    # x tile
            resident_spec((F_in, H)), resident_spec((1, H)),     # w0, b0+pe0
            resident_spec((H, H)),    resident_spec((1, H)),     # w1, b1+pe1
            resident_spec((H, H)),    resident_spec((1, H)),     # w2, b2+pe2
            resident_spec((H, C_pad)), resident_spec((1, C_pad)),  # w3, b3
        ]

        out_shapes, out_specs = [], []
        if return_intermediates:
            out_shapes += [jax.ShapeDtypeStruct((B, H), act_dtype),   # h1
                           jax.ShapeDtypeStruct((B, H), act_dtype)]   # h2
            out_specs += [batch_spec(H), batch_spec(H)]
        out_shapes += [jax.ShapeDtypeStruct((B, H), jnp.float32),     # h3
                       jax.ShapeDtypeStruct((B, C_pad), jnp.float32)]  # out
        out_specs += [batch_spec(H), batch_spec(C_pad)]

        return pl.pallas_call(
            _make_mlp_pe_kernel(return_intermediates),
            out_shape=tuple(out_shapes),
            grid=grid,
            in_specs=in_specs,
            out_specs=out_specs,
            compiler_params=pltpu.CompilerParams(**compiler_kwargs),
            cost_estimate=cost,
        )(xk, w0c, bpe0, w1c, bpe1, w2c, bpe2, w3p, b3p)

    if single_buffer_weights:
        try:
            results = run(True)
        except Exception:
            # pl.Buffered(1) unsupported on this jax build -> default buffering
            results = run(False)
    else:
        results = run(False)

    if return_intermediates:
        h1, h2, hs0, outp = results
    else:
        hs0, outp = results

    hs = outp[:, :C]
    if return_intermediates:
        all_hs = [xf, h1, h2, hs0, hs]
        return all_hs, hs0, hs
    return None, hs0, hs


# ----------------------------------------------------------------------------
# Deterministic parameter construction (PyTorch nn.Linear-style uniform init).
# Weights stored as (in, out) == PyTorch weight.T, in float32.
# ----------------------------------------------------------------------------
def init_params(key, input_size, n_hidden, n_classes):
    dims = [(input_size, n_hidden), (n_hidden, n_hidden),
            (n_hidden, n_hidden), (n_hidden, n_classes)]
    params = []
    for (fan_in, fan_out) in dims:
        key, kw, kb = jax.random.split(key, 3)
        bound = 1.0 / np.sqrt(fan_in)
        w = jax.random.uniform(kw, (fan_in, fan_out), jnp.float32, -bound, bound)
        b = jax.random.uniform(kb, (1, fan_out), jnp.float32, -bound, bound)
        params += [w, b]
    return tuple(params)


def reference_forward(x, params, pes, weight_dtype=jnp.bfloat16):
    """Pure-JAX reference matching the kernel's mixed-precision numerics."""
    w0, b0, w1, b1, w2, b2, w3, b3 = params
    pe0, pe1, pe2 = pes
    xf = x.reshape(x.shape[0], -1).astype(jnp.float32)

    def mm(a, w):
        return jnp.dot(a.astype(weight_dtype), w.astype(weight_dtype),
                       preferred_element_type=jnp.float32)

    h1 = jnp.maximum(mm(xf, w0) + b0 + pe0, 0.0)
    h2 = jnp.maximum(mm(h1, w1) + b1 + pe1, 0.0)
    h3 = jnp.maximum(mm(h2, w2) + b2 + pe2, 0.0)
    out = mm(h3, w3) + b3
    return [xf, h1, h2, h3, out], h3, out


if __name__ == "__main__":
    # small shapes consistent with the module: batch=10 (exercises the ragged
    # last block and a 2-step parallel grid), input 1x16x16 flattened to 256,
    # n_hidden=256, n_classes=10 (exercises classifier lane-padding).
    B, Cc, Hh, Ww = 10, 1, 16, 16
    input_size = Cc * Hh * Ww
    n_hidden = 256
    n_classes = 10

    key = jax.random.PRNGKey(0)
    key, kx = jax.random.split(key)
    x = jax.random.normal(kx, (B, Cc, Hh, Ww), jnp.float32)

    params = init_params(key, input_size, n_hidden, n_classes)
    pes = tuple(sin_pe_mask("add", 1.0, 1.0, 1.0, n_hidden) for _ in range(3))

    # full path (all_hs, hs0, hs)
    all_hs, hs0, hs = mlp_pe_forward(x, params, pes)
    jax.block_until_ready(hs)
    jax.block_until_ready(hs0)
    for h in all_hs:
        jax.block_until_ready(h)

    # lean path (no intermediate writebacks)
    _, hs0_lean, hs_lean = mlp_pe_forward(x, params, pes,
                                          return_intermediates=False)
    jax.block_until_ready(hs_lean)

    # correctness check against a pure-JAX reference with matching mixed
    # precision (bf16 operands, f32 accumulation)
    ref_all, ref_hs0, ref_hs = reference_forward(x, params, pes)

    # x_flat is an exact reshape/cast
    np.testing.assert_allclose(np.asarray(all_hs[0]), np.asarray(ref_all[0]))
    # h1 / h2 are stored in bf16 -> compare within ~1 bf16 ulp
    for a, r in zip(all_hs[1:3], ref_all[1:3]):
        np.testing.assert_allclose(np.asarray(a.astype(jnp.float32)),
                                   np.asarray(r), rtol=2e-2, atol=2e-2)
    # f32 outputs
    np.testing.assert_allclose(np.asarray(all_hs[3]), np.asarray(ref_hs0),
                               rtol=1e-4, atol=1e-4)
    np.testing.assert_allclose(np.asarray(all_hs[4]), np.asarray(ref_hs),
                               rtol=1e-4, atol=1e-4)
    np.testing.assert_allclose(np.asarray(hs0), np.asarray(ref_hs0),
                               rtol=1e-4, atol=1e-4)
    np.testing.assert_allclose(np.asarray(hs), np.asarray(ref_hs),
                               rtol=1e-4, atol=1e-4)
    np.testing.assert_allclose(np.asarray(hs0_lean), np.asarray(ref_hs0),
                               rtol=1e-4, atol=1e-4)
    np.testing.assert_allclose(np.asarray(hs_lean), np.asarray(ref_hs),
                               rtol=1e-4, atol=1e-4)

    print("KERNEL_OK")
</pallas_src>

<mosaic_0001>
module attributes {stable_mosaic.version = 11 : i64} {
  func.func @kernel(%arg0: i32, %arg1: memref<8x256xbf16, #tpu.memory_space<vmem>>, %arg2: memref<256x256xbf16, #tpu.memory_space<vmem>>, %arg3: memref<1x256xf32, #tpu.memory_space<vmem>>, %arg4: memref<256x256xbf16, #tpu.memory_space<vmem>>, %arg5: memref<1x256xf32, #tpu.memory_space<vmem>>, %arg6: memref<256x256xbf16, #tpu.memory_space<vmem>>, %arg7: memref<1x256xf32, #tpu.memory_space<vmem>>, %arg8: memref<256x128xbf16, #tpu.memory_space<vmem>>, %arg9: memref<1x128xf32, #tpu.memory_space<vmem>>, %arg10: memref<8x256xbf16, #tpu.memory_space<vmem>>, %arg11: memref<8x256xbf16, #tpu.memory_space<vmem>>, %arg12: memref<8x256xf32, #tpu.memory_space<vmem>>, %arg13: memref<8x128xf32, #tpu.memory_space<vmem>>) attributes {dimension_semantics = [#tpu.dimension_semantics<parallel>], iteration_bounds = array<i64: 2>, scalar_prefetch = 0 : i64, scratch_operands = 0 : i64, tpu.core_type = #tpu.core_type<tc>, window_params = [{transform_indices = @transform_0, window_bounds = array<i64: 8, 256>}, {pipeline_mode = #tpu.pipeline_mode<synchronous>, transform_indices = @transform_1, window_bounds = array<i64: 256, 256>}, {pipeline_mode = #tpu.pipeline_mode<synchronous>, transform_indices = @transform_2, window_bounds = array<i64: 1, 256>}, {pipeline_mode = #tpu.pipeline_mode<synchronous>, transform_indices = @transform_3, window_bounds = array<i64: 256, 256>}, {pipeline_mode = #tpu.pipeline_mode<synchronous>, transform_indices = @transform_4, window_bounds = array<i64: 1, 256>}, {pipeline_mode = #tpu.pipeline_mode<synchronous>, transform_indices = @transform_5, window_bounds = array<i64: 256, 256>}, {pipeline_mode = #tpu.pipeline_mode<synchronous>, transform_indices = @transform_6, window_bounds = array<i64: 1, 256>}, {pipeline_mode = #tpu.pipeline_mode<synchronous>, transform_indices = @transform_7, window_bounds = array<i64: 256, 128>}, {pipeline_mode = #tpu.pipeline_mode<synchronous>, transform_indices = @transform_8, window_bounds = array<i64: 1, 128>}, {transform_indices = @transform_9, window_bounds = array<i64: 8, 256>}, {transform_indices = @transform_10, window_bounds = array<i64: 8, 256>}, {transform_indices = @transform_11, window_bounds = array<i64: 8, 256>}, {transform_indices = @transform_12, window_bounds = array<i64: 8, 128>}]} {
    %c0 = arith.constant 0 : index
    %c0_0 = arith.constant 0 : index
    %0 = vector.load %arg1[%c0, %c0_0] : memref<8x256xbf16, #tpu.memory_space<vmem>>, vector<8x256xbf16>
    %c0_1 = arith.constant 0 : index
    %c0_2 = arith.constant 0 : index
    %1 = vector.load %arg2[%c0_1, %c0_2] : memref<256x256xbf16, #tpu.memory_space<vmem>>, vector<256x256xbf16>
    %cst = arith.constant dense<0.000000e+00> : vector<8x256xf32>
    %2 = tpu.matmul %0, %1, %cst {dimension_numbers = #tpu.dot_dimension_numbers<[1], [0], [0], [1], [0, 0, 1, 1], [], []>} : vector<8x256xbf16>, vector<256x256xbf16>, vector<8x256xf32> -> vector<8x256xf32>
    %c0_3 = arith.constant 0 : index
    %c0_4 = arith.constant 0 : index
    %3 = vector.load %arg3[%c0_3, %c0_4] : memref<1x256xf32, #tpu.memory_space<vmem>>, vector<1x256xf32>
    %4 = vector.broadcast %3 : vector<1x256xf32> to vector<8x256xf32>
    %5 = arith.addf %2, %4 : vector<8x256xf32>
    %cst_5 = arith.constant 0.000000e+00 : f32
    %6 = vector.broadcast %cst_5 : f32 to vector<8x256xf32>
    %7 = arith.maximumf %5, %6 : vector<8x256xf32>
    %8 = arith.truncf %7 : vector<8x256xf32> to vector<8x256xbf16>
    %c0_6 = arith.constant 0 : index
    %c0_7 = arith.constant 0 : index
    %9 = vector.load %arg10[%c0_6, %c0_7] : memref<8x256xbf16, #tpu.memory_space<vmem>>, vector<8x256xbf16>
    tpu.vector_store %arg10[%c0_6, %c0_7], %8 {strides = array<i32>} : memref<8x256xbf16, #tpu.memory_space<vmem>>, vector<8x256xbf16>,
    %10 = arith.truncf %7 : vector<8x256xf32> to vector<8x256xbf16>
    %c0_8 = arith.constant 0 : index
    %c0_9 = arith.constant 0 : index
    %11 = vector.load %arg4[%c0_8, %c0_9] : memref<256x256xbf16, #tpu.memory_space<vmem>>, vector<256x256xbf16>
    %cst_10 = arith.constant dense<0.000000e+00> : vector<8x256xf32>
    %12 = tpu.matmul %10, %11, %cst_10 {dimension_numbers = #tpu.dot_dimension_numbers<[1], [0], [0], [1], [0, 0, 1, 1], [], []>} : vector<8x256xbf16>, vector<256x256xbf16>, vector<8x256xf32> -> vector<8x256xf32>
    %c0_11 = arith.constant 0 : index
    %c0_12 = arith.constant 0 : index
    %13 = vector.load %arg5[%c0_11, %c0_12] : memref<1x256xf32, #tpu.memory_space<vmem>>, vector<1x256xf32>
    %14 = vector.broadcast %13 : vector<1x256xf32> to vector<8x256xf32>
    %15 = arith.addf %12, %14 : vector<8x256xf32>
    %cst_13 = arith.constant 0.000000e+00 : f32
    %16 = vector.broadcast %cst_13 : f32 to vector<8x256xf32>
    %17 = arith.maximumf %15, %16 : vector<8x256xf32>
    %18 = arith.truncf %17 : vector<8x256xf32> to vector<8x256xbf16>
    %c0_14 = arith.constant 0 : index
    %c0_15 = arith.constant 0 : index
    %19 = vector.load %arg11[%c0_14, %c0_15] : memref<8x256xbf16, #tpu.memory_space<vmem>>, vector<8x256xbf16>
    tpu.vector_store %arg11[%c0_14, %c0_15], %18 {strides = array<i32>} : memref<8x256xbf16, #tpu.memory_space<vmem>>, vector<8x256xbf16>,
    %20 = arith.truncf %17 : vector<8x256xf32> to vector<8x256xbf16>
    %c0_16 = arith.constant 0 : index
    %c0_17 = arith.constant 0 : index
    %21 = vector.load %arg6[%c0_16, %c0_17] : memref<256x256xbf16, #tpu.memory_space<vmem>>, vector<256x256xbf16>
    %cst_18 = arith.constant dense<0.000000e+00> : vector<8x256xf32>
    %22 = tpu.matmul %20, %21, %cst_18 {dimension_numbers = #tpu.dot_dimension_numbers<[1], [0], [0], [1], [0, 0, 1, 1], [], []>} : vector<8x256xbf16>, vector<256x256xbf16>, vector<8x256xf32> -> vector<8x256xf32>
    %c0_19 = arith.constant 0 : index
    %c0_20 = arith.constant 0 : index
    %23 = vector.load %arg7[%c0_19, %c0_20] : memref<1x256xf32, #tpu.memory_space<vmem>>, vector<1x256xf32>
    %24 = vector.broadcast %23 : vector<1x256xf32> to vector<8x256xf32>
    %25 = arith.addf %22, %24 : vector<8x256xf32>
    %cst_21 = arith.constant 0.000000e+00 : f32
    %26 = vector.broadcast %cst_21 : f32 to vector<8x256xf32>
    %27 = arith.maximumf %25, %26 : vector<8x256xf32>
    %c0_22 = arith.constant 0 : index
    %c0_23 = arith.constant 0 : index
    %28 = vector.load %arg12[%c0_22, %c0_23] : memref<8x256xf32, #tpu.memory_space<vmem>>, vector<8x256xf32>
    tpu.vector_store %arg12[%c0_22, %c0_23], %27 {strides = array<i32>} : memref<8x256xf32, #tpu.memory_space<vmem>>, vector<8x256xf32>,
    %29 = arith.truncf %27 : vector<8x256xf32> to vector<8x256xbf16>
    %c0_24 = arith.constant 0 : index
    %c0_25 = arith.constant 0 : index
    %30 = vector.load %arg8[%c0_24, %c0_25] : memref<256x128xbf16, #tpu.memory_space<vmem>>, vector<256x128xbf16>
    %cst_26 = arith.constant dense<0.000000e+00> : vector<8x128xf32>
    %31 = tpu.matmul %29, %30, %cst_26 {dimension_numbers = #tpu.dot_dimension_numbers<[1], [0], [0], [1], [0, 0, 1, 1], [], []>} : vector<8x256xbf16>, vector<256x128xbf16>, vector<8x128xf32> -> vector<8x128xf32>
    %c0_27 = arith.constant 0 : index
    %c0_28 = arith.constant 0 : index
    %32 = vector.load %arg9[%c0_27, %c0_28] : memref<1x128xf32, #tpu.memory_space<vmem>>, vector<1x128xf32>
    %33 = vector.broadcast %32 : vector<1x128xf32> to vector<8x128xf32>
    %34 = arith.addf %31, %33 : vector<8x128xf32>
    %c0_29 = arith.constant 0 : index
    %c0_30 = arith.constant 0 : index
    %35 = vector.load %arg13[%c0_29, %c0_30] : memref<8x128xf32, #tpu.memory_space<vmem>>, vector<8x128xf32>
    tpu.vector_store %arg13[%c0_29, %c0_30], %34 {strides = array<i32>} : memref<8x128xf32, #tpu.memory_space<vmem>>, vector<8x128xf32>,
    return
  }
  func.func @transform_0(%arg0: i32) -> (i32, i32) {
    %c0_i32 = arith.constant 0 : i32
    %c0_i32_0 = arith.constant 0 : i32
    return %arg0, %c0_i32 : i32, i32
  }
  func.func @transform_1(%arg0: i32) -> (i32, i32) {
    %c0_i32 = arith.constant 0 : i32
    %c0_i32_0 = arith.constant 0 : i32
    %c0_i32_1 = arith.constant 0 : i32
    return %c0_i32, %c0_i32_0 : i32, i32
  }
  func.func @transform_2(%arg0: i32) -> (i32, i32) {
    %c0_i32 = arith.constant 0 : i32
    %c0_i32_0 = arith.constant 0 : i32
    %c0_i32_1 = arith.constant 0 : i32
    return %c0_i32, %c0_i32_0 : i32, i32
  }
  func.func @transform_3(%arg0: i32) -> (i32, i32) {
    %c0_i32 = arith.constant 0 : i32
    %c0_i32_0 = arith.constant 0 : i32
    %c0_i32_1 = arith.constant 0 : i32
    return %c0_i32, %c0_i32_0 : i32, i32
  }
  func.func @transform_4(%arg0: i32) -> (i32, i32) {
    %c0_i32 = arith.constant 0 : i32
    %c0_i32_0 = arith.constant 0 : i32
    %c0_i32_1 = arith.constant 0 : i32
    return %c0_i32, %c0_i32_0 : i32, i32
  }
  func.func @transform_5(%arg0: i32) -> (i32, i32) {
    %c0_i32 = arith.constant 0 : i32
    %c0_i32_0 = arith.constant 0 : i32
    %c0_i32_1 = arith.constant 0 : i32
    return %c0_i32, %c0_i32_0 : i32, i32
  }
  func.func @transform_6(%arg0: i32) -> (i32, i32) {
    %c0_i32 = arith.constant 0 : i32
    %c0_i32_0 = arith.constant 0 : i32
    %c0_i32_1 = arith.constant 0 : i32
    return %c0_i32, %c0_i32_0 : i32, i32
  }
  func.func @transform_7(%arg0: i32) -> (i32, i32) {
    %c0_i32 = arith.constant 0 : i32
    %c0_i32_0 = arith.constant 0 : i32
    %c0_i32_1 = arith.constant 0 : i32
    return %c0_i32, %c0_i32_0 : i32, i32
  }
  func.func @transform_8(%arg0: i32) -> (i32, i32) {
    %c0_i32 = arith.constant 0 : i32
    %c0_i32_0 = arith.constant 0 : i32
    %c0_i32_1 = arith.constant 0 : i32
    return %c0_i32, %c0_i32_0 : i32, i32
  }
  func.func @transform_9(%arg0: i32) -> (i32, i32) {
    %c0_i32 = arith.constant 0 : i32
    %c0_i32_0 = arith.constant 0 : i32
    return %arg0, %c0_i32 : i32, i32
  }
  func.func @transform_10(%arg0: i32) -> (i32, i32) {
    %c0_i32 = arith.constant 0 : i32
    %c0_i32_0 = arith.constant 0 : i32
    return %arg0, %c0_i32 : i32, i32
  }
  func.func @transform_11(%arg0: i32) -> (i32, i32) {
    %c0_i32 = arith.constant 0 : i32
    %c0_i32_0 = arith.constant 0 : i32
    return %arg0, %c0_i32 : i32, i32
  }
  func.func @transform_12(%arg0: i32) -> (i32, i32) {
    %c0_i32 = arith.constant 0 : i32
    %c0_i32_0 = arith.constant 0 : i32
    return %arg0, %c0_i32 : i32, i32
  }
}

module attributes {stable_mosaic.version = 11 : i64} {
  func.func @kernel(%arg0: i32, %arg1: memref<8x256xbf16, #tpu.memory_space<vmem>>, %arg2: memref<256x256xbf16, #tpu.memory_space<vmem>>, %arg3: memref<1x256xf32, #tpu.memory_space<vmem>>, %arg4: memref<256x256xbf16, #tpu.memory_space<vmem>>, %arg5: memref<1x256xf32, #tpu.memory_space<vmem>>, %arg6: memref<256x256xbf16, #tpu.memory_space<vmem>>, %arg7: memref<1x256xf32, #tpu.memory_space<vmem>>, %arg8: memref<256x128xbf16, #tpu.memory_space<vmem>>, %arg9: memref<1x128xf32, #tpu.memory_space<vmem>>, %arg10: memref<8x256xbf16, #tpu.memory_space<vmem>>, %arg11: memref<8x256xbf16, #tpu.memory_space<vmem>>, %arg12: memref<8x256xf32, #tpu.memory_space<vmem>>, %arg13: memref<8x128xf32, #tpu.memory_space<vmem>>) attributes {dimension_semantics = [#tpu.dimension_semantics<parallel>], iteration_bounds = array<i64: 2>, scalar_prefetch = 0 : i64, scratch_operands = 0 : i64, tpu.core_type = #tpu.core_type<tc>, window_params = [{transform_indices = @transform_0, window_bounds = array<i64: 8, 256>}, {pipeline_mode = #tpu.pipeline_mode<synchronous>, transform_indices = @transform_1, window_bounds = array<i64: 256, 256>}, {pipeline_mode = #tpu.pipeline_mode<synchronous>, transform_indices = @transform_2, window_bounds = array<i64: 1, 256>}, {pipeline_mode = #tpu.pipeline_mode<synchronous>, transform_indices = @transform_3, window_bounds = array<i64: 256, 256>}, {pipeline_mode = #tpu.pipeline_mode<synchronous>, transform_indices = @transform_4, window_bounds = array<i64: 1, 256>}, {pipeline_mode = #tpu.pipeline_mode<synchronous>, transform_indices = @transform_5, window_bounds = array<i64: 256, 256>}, {pipeline_mode = #tpu.pipeline_mode<synchronous>, transform_indices = @transform_6, window_bounds = array<i64: 1, 256>}, {pipeline_mode = #tpu.pipeline_mode<synchronous>, transform_indices = @transform_7, window_bounds = array<i64: 256, 128>}, {pipeline_mode = #tpu.pipeline_mode<synchronous>, transform_indices = @transform_8, window_bounds = array<i64: 1, 128>}, {transform_indices = @transform_9, window_bounds = array<i64: 8, 256>}, {transform_indices = @transform_10, window_bounds = array<i64: 8, 256>}, {transform_indices = @transform_11, window_bounds = array<i64: 8, 256>}, {transform_indices = @transform_12, window_bounds = array<i64: 8, 128>}]} {
    %c0 = arith.constant 0 : index
    %c0_0 = arith.constant 0 : index
    %0 = vector.load %arg1[%c0, %c0_0] : memref<8x256xbf16, #tpu.memory_space<vmem>>, vector<8x256xbf16>
    %c0_1 = arith.constant 0 : index
    %c0_2 = arith.constant 0 : index
    %1 = vector.load %arg2[%c0_1, %c0_2] : memref<256x256xbf16, #tpu.memory_space<vmem>>, vector<256x256xbf16>
    %cst = arith.constant dense<0.000000e+00> : vector<8x256xf32>
    %2 = tpu.matmul %0, %1, %cst {dimension_numbers = #tpu.dot_dimension_numbers<[1], [0], [0], [1], [0, 0, 1, 1], [], []>} : vector<8x256xbf16>, vector<256x256xbf16>, vector<8x256xf32> -> vector<8x256xf32>
    %c0_3 = arith.constant 0 : index
    %c0_4 = arith.constant 0 : index
    %3 = vector.load %arg3[%c0_3, %c0_4] : memref<1x256xf32, #tpu.memory_space<vmem>>, vector<1x256xf32>
    %4 = vector.broadcast %3 : vector<1x256xf32> to vector<8x256xf32>
    %5 = arith.addf %2, %4 : vector<8x256xf32>
    %cst_5 = arith.constant 0.000000e+00 : f32
    %6 = vector.broadcast %cst_5 : f32 to vector<8x256xf32>
    %7 = arith.maximumf %5, %6 : vector<8x256xf32>
    %8 = arith.truncf %7 : vector<8x256xf32> to vector<8x256xbf16>
    %c0_6 = arith.constant 0 : index
    %c0_7 = arith.constant 0 : index
    %9 = vector.load %arg10[%c0_6, %c0_7] : memref<8x256xbf16, #tpu.memory_space<vmem>>, vector<8x256xbf16>
    tpu.vector_store %arg10[%c0_6, %c0_7], %8 {strides = array<i32>} : memref<8x256xbf16, #tpu.memory_space<vmem>>, vector<8x256xbf16>,
    %10 = arith.truncf %7 : vector<8x256xf32> to vector<8x256xbf16>
    %c0_8 = arith.constant 0 : index
    %c0_9 = arith.constant 0 : index
    %11 = vector.load %arg4[%c0_8, %c0_9] : memref<256x256xbf16, #tpu.memory_space<vmem>>, vector<256x256xbf16>
    %cst_10 = arith.constant dense<0.000000e+00> : vector<8x256xf32>
    %12 = tpu.matmul %10, %11, %cst_10 {dimension_numbers = #tpu.dot_dimension_numbers<[1], [0], [0], [1], [0, 0, 1, 1], [], []>} : vector<8x256xbf16>, vector<256x256xbf16>, vector<8x256xf32> -> vector<8x256xf32>
    %c0_11 = arith.constant 0 : index
    %c0_12 = arith.constant 0 : index
    %13 = vector.load %arg5[%c0_11, %c0_12] : memref<1x256xf32, #tpu.memory_space<vmem>>, vector<1x256xf32>
    %14 = vector.broadcast %13 : vector<1x256xf32> to vector<8x256xf32>
    %15 = arith.addf %12, %14 : vector<8x256xf32>
    %cst_13 = arith.constant 0.000000e+00 : f32
    %16 = vector.broadcast %cst_13 : f32 to vector<8x256xf32>
    %17 = arith.maximumf %15, %16 : vector<8x256xf32>
    %18 = arith.truncf %17 : vector<8x256xf32> to vector<8x256xbf16>
    %c0_14 = arith.constant 0 : index
    %c0_15 = arith.constant 0 : index
    %19 = vector.load %arg11[%c0_14, %c0_15] : memref<8x256xbf16, #tpu.memory_space<vmem>>, vector<8x256xbf16>
    tpu.vector_store %arg11[%c0_14, %c0_15], %18 {strides = array<i32>} : memref<8x256xbf16, #tpu.memory_space<vmem>>, vector<8x256xbf16>,
    %20 = arith.truncf %17 : vector<8x256xf32> to vector<8x256xbf16>
    %c0_16 = arith.constant 0 : index
    %c0_17 = arith.constant 0 : index
    %21 = vector.load %arg6[%c0_16, %c0_17] : memref<256x256xbf16, #tpu.memory_space<vmem>>, vector<256x256xbf16>
    %cst_18 = arith.constant dense<0.000000e+00> : vector<8x256xf32>
    %22 = tpu.matmul %20, %21, %cst_18 {dimension_numbers = #tpu.dot_dimension_numbers<[1], [0], [0], [1], [0, 0, 1, 1], [], []>} : vector<8x256xbf16>, vector<256x256xbf16>, vector<8x256xf32> -> vector<8x256xf32>
    %c0_19 = arith.constant 0 : index
    %c0_20 = arith.constant 0 : index
    %23 = vector.load %arg7[%c0_19, %c0_20] : memref<1x256xf32, #tpu.memory_space<vmem>>, vector<1x256xf32>
    %24 = vector.broadcast %23 : vector<1x256xf32> to vector<8x256xf32>
    %25 = arith.addf %22, %24 : vector<8x256xf32>
    %cst_21 = arith.constant 0.000000e+00 : f32
    %26 = vector.broadcast %cst_21 : f32 to vector<8x256xf32>
    %27 = arith.maximumf %25, %26 : vector<8x256xf32>
    %c0_22 = arith.constant 0 : index
    %c0_23 = arith.constant 0 : index
    %28 = vector.load %arg12[%c0_22, %c0_23] : memref<8x256xf32, #tpu.memory_space<vmem>>, vector<8x256xf32>
    tpu.vector_store %arg12[%c0_22, %c0_23], %27 {strides = array<i32>} : memref<8x256xf32, #tpu.memory_space<vmem>>, vector<8x256xf32>,
    %29 = arith.truncf %27 : vector<8x256xf32> to vector<8x256xbf16>
    %c0_24 = arith.constant 0 : index
    %c0_25 = arith.constant 0 : index
    %30 = vector.load %arg8[%c0_24, %c0_25] : memref<256x128xbf16, #tpu.memory_space<vmem>>, vector<256x128xbf16>
    %cst_26 = arith.constant dense<0.000000e+00> : vector<8x128xf32>
    %31 = tpu.matmul %29, %30, %cst_26 {dimension_numbers = #tpu.dot_dimension_numbers<[1], [0], [0], [1], [0, 0, 1, 1], [], []>} : vector<8x256xbf16>, vector<256x128xbf16>, vector<8x128xf32> -> vector<8x128xf32>
    %c0_27 = arith.constant 0 : index
    %c0_28 = arith.constant 0 : index
    %32 = vector.load %arg9[%c0_27, %c0_28] : memref<1x128xf32, #tpu.memory_space<vmem>>, vector<1x128xf32>
    %33 = vector.broadcast %32 : vector<1x128xf32> to vector<8x128xf32>
    %34 = arith.addf %31, %33 : vector<8x128xf32>
    %c0_29 = arith.constant 0 : index
    %c0_30 = arith.constant 0 : index
    %35 = vector.load %arg13[%c0_29, %c0_30] : memref<8x128xf32, #tpu.memory_space<vmem>>, vector<8x128xf32>
    tpu.vector_store %arg13[%c0_29, %c0_30], %34 {strides = array<i32>} : memref<8x128xf32, #tpu.memory_space<vmem>>, vector<8x128xf32>,
    return
  }
  func.func @transform_0(%arg0: i32) -> (i32, i32) {
    %c0_i32 = arith.constant 0 : i32
    %c0_i32_0 = arith.constant 0 : i32
    return %arg0, %c0_i32 : i32, i32
  }
  func.func @transform_1(%arg0: i32) -> (i32, i32) {
    %c0_i32 = arith.constant 0 : i32
    %c0_i32_0 = arith.constant 0 : i32
    %c0_i32_1 = arith.constant 0 : i32
    return %c0_i32, %c0_i32_0 : i32, i32
  }
  func.func @transform_2(%arg0: i32) -> (i32, i32) {
    %c0_i32 = arith.constant 0 : i32
    %c0_i32_0 = arith.constant 0 : i32
    %c0_i32_1 = arith.constant 0 : i32
    return %c0_i32, %c0_i32_0 : i32, i32
  }
  func.func @transform_3(%arg0: i32) -> (i32, i32) {
    %c0_i32 = arith.constant 0 : i32
    %c0_i32_0 = arith.constant 0 : i32
    %c0_i32_1 = arith.constant 0 : i32
    return %c0_i32, %c0_i32_0 : i32, i32
  }
  func.func @transform_4(%arg0: i32) -> (i32, i32) {
    %c0_i32 = arith.constant 0 : i32
    %c0_i32_0 = arith.constant 0 : i32
    %c0_i32_1 = arith.constant 0 : i32
    return %c0_i32, %c0_i32_0 : i32, i32
  }
  func.func @transform_5(%arg0: i32) -> (i32, i32) {
    %c0_i32 = arith.constant 0 : i32
    %c0_i32_0 = arith.constant 0 : i32
    %c0_i32_1 = arith.constant 0 : i32
    return %c0_i32, %c0_i32_0 : i32, i32
  }
  func.func @transform_6(%arg0: i32) -> (i32, i32) {
    %c0_i32 = arith.constant 0 : i32
    %c0_i32_0 = arith.constant 0 : i32
    %c0_i32_1 = arith.constant 0 : i32
    return %c0_i32, %c0_i32_0 : i32, i32
  }
  func.func @transform_7(%arg0: i32) -> (i32, i32) {
    %c0_i32 = arith.constant 0 : i32
    %c0_i32_0 = arith.constant 0 : i32
    %c0_i32_1 = arith.constant 0 : i32
    return %c0_i32, %c0_i32_0 : i32, i32
  }
  func.func @transform_8(%arg0: i32) -> (i32, i32) {
    %c0_i32 = arith.constant 0 : i32
    %c0_i32_0 = arith.constant 0 : i32
    %c0_i32_1 = arith.constant 0 : i32
    return %c0_i32, %c0_i32_0 : i32, i32
  }
  func.func @transform_9(%arg0: i32) -> (i32, i32) {
    %c0_i32 = arith.constant 0 : i32
    %c0_i32_0 = arith.constant 0 : i32
    return %arg0, %c0_i32 : i32, i32
  }
  func.func @transform_10(%arg0: i32) -> (i32, i32) {
    %c0_i32 = arith.constant 0 : i32
    %c0_i32_0 = arith.constant 0 : i32
    return %arg0, %c0_i32 : i32, i32
  }
  func.func @transform_11(%arg0: i32) -> (i32, i32) {
    %c0_i32 = arith.constant 0 : i32
    %c0_i32_0 = arith.constant 0 : i32
    return %arg0, %c0_i32 : i32, i32
  }
  func.func @transform_12(%arg0: i32) -> (i32, i32) {
    %c0_i32 = arith.constant 0 : i32
    %c0_i32_0 = arith.constant 0 : i32
    return %arg0, %c0_i32 : i32, i32
  }
}

</mosaic_0001>

<bundles_post_ra>
// kernel: tpu_custom_call.1
= control target key start
LH: loop header
LB: loop body
LE: loop exit
PB: predicated region body
PF: predicated region fallthrough
CT: control target
= control target key end

     0   :  { %s3004_s0 = inlined_call_operand.hbm [shape: bf16[10,256], index: 0, kind: input, shape index: {}]   ;;  %s3005_s1 = inlined_call_operand.hbm [shape: bf16[256,256], index: 1, kind: input, shape index: {}]   ;;  %s3006_s2 = inlined_call_operand.vmem [shape: f32[1,256], index: 2, kind: input, shape index: {}]   ;;  %s3007_s3 = inlined_call_operand.hbm [shape: bf16[256,256], index: 3, kind: input, shape index: {}]   ;;  %s3008_s4 = inlined_call_operand.vmem [shape: f32[1,256], index: 4, kind: input, shape index: {}]   ;;  %s3009_s5 = inlined_call_operand.hbm [shape: bf16[256,256], index: 5, kind: input, shape index: {}]   ;;  %s3010_s6 = inlined_call_operand.vmem [shape: f32[1,256], index: 6, kind: input, shape index: {}]   ;;  %s3011_s7 = inlined_call_operand.hbm [shape: bf16[256,128], index: 7, kind: input, shape index: {}]   ;;  %s3012_s8 = inlined_call_operand.vmem [shape: f32[1,128], index: 8, kind: input, shape index: {}]   ;;  %s3013_s9 = inlined_call_operand.hbm [shape: bf16[10,256], index: 9, kind: output, shape index: {0}]   ;;  %s3014_s10 = inlined_call_operand.hbm [shape: bf16[10,256], index: 10, kind: output, shape index: {1}]   ;;  %s3015_s11 = inlined_call_operand.hbm [shape: f32[10,256], index: 11, kind: output, shape index: {2}]   ;;  %s3016_s12 = inlined_call_operand.hbm [shape: f32[10,128], index: 12, kind: output, shape index: {3}]  }
   0x1   :  { %3025 = sst [smem:[#allocation23_spill]] %s3004_s0 }
   0x2   :  { %3026 = sst [smem:[#allocation24_spill]] %s3005_s1 }
   0x3   :  { %3027 = sst [smem:[#allocation25_spill]] %s3006_s2 }
   0x4   :  { %3028 = sst [smem:[#allocation26_spill]] %s3007_s3 }
   0x5   :  { %3029 = sst [smem:[#allocation27_spill]] %s3008_s4 }
   0x6   :  { %3030 = sst [smem:[#allocation28_spill]] %s3012_s8 }
   0x7   :  { %3031 = sst [smem:[#allocation29_spill]] %s3013_s9 }
   0x8   :  { %3032 = sst [smem:[#allocation30_spill]] %s3015_s11 }
   0x9   :  { %3033 = sst [smem:[#allocation31_spill]] %s3016_s12 }
   0xa   :  { %18 = vsyncpa [#allocation3], 0 }
   0xb   :  { %20 = vsyncpa [#allocation3 + $0x1], 0 }
   0xc   :  { %21 = vsyncpa [#allocation6], 0 }
   0xd   :  { %22 = vsyncpa [#allocation9], 0 }
   0xe   :  { %23 = vsyncpa [#allocation4], 0 }
   0xf   :  { %25 = vsyncpa [#allocation4 + $0x1], 0 }
  0x10   :  { %26 = vsyncpa [#allocation13], 0 }
  0x11   :  { %28 = vsyncpa [#allocation13 + $0x1], 0 }
  0x12   :  { %29 = vsyncpa [#allocation16], 0 }
  0x13   :  { %31 = vsyncpa [#allocation16 + $0x1], 0  ;;  %s2570_s21 = smov 0   ;;  %s2572_s22 = smov 0  }
  0x14   :  { %s2574_s23 = smov 0   ;;  %s2576_s24 = smov 0  }
  0x15 LB: > { %s2492_s25 = smov [#allocation5]   ;;  %s2591_s27 = sadd.s32 4294967295, %s2490_s24   ;;  %s2490_s24 = sphi %s2576_s24, %s3065_s24   ;;  %s2486_s23 = sphi %s2574_s23, %s3064_s23   ;;  %s2482_s22 = sphi %s2572_s22, %s3063_s22   ;;  %s2478_s21 = sphi %s2570_s21, %s3062_s21  }
  0x16   : > { %s352_s26 = sshll.u32 %s2492_s25, 4  ;;  %p1737_p0 = scmp.ge.s32.totalorder %s2490_s24, 1  ;;  %s2596_s26 = int_to_ptr.vmem [resolvable:$true] %s352_s26 }
  0x17   : > { %p3020_p1 = scmp.eq.s32.totalorder %s2591_s27, 0  ;;  %p340_p2 = scmp.lt.s32.totalorder %s2490_s24, 3 }
  0x18   : > { %s2493_s29 = smov [#allocation8]   ;;  %s2494_s14 = smov [#allocation7]  }
  0x19   : > { %p2598_p3 = pnand %p1737_p0, %p340_p2  ;;  %s384_s30 = sshll.u32 %s2493_s29, 4  ;;  %s2611_s30 = int_to_ptr.vmem [resolvable:$true] %s384_s30 }
  0x1a   : > { %s368_s15 = sshll.u32 %s2494_s14, 4  ;;  %s3036_s1 = sld [smem:[#allocation24_spill]]  ;;  %s2613_s15 = int_to_ptr.vmem [resolvable:$true] %s368_s15 }
  0x1b   : > { %s3034_s28 = scalar_select %p2598_p3, 1, 0 }
  0x1c   : > { %p1940_p5 = pneg %p2598_p3 }
  0x1e   : > { %p2607_p6 = pnand %p1940_p5, %p3020_p1 }
  0x20   : > { %s2182_s18 = scalar_lea.hbm %s3036_s1, 4096  ;;  %p2623_p8 = pneg %p2607_p6 }
  0x21   : > { %p2183_p7 = scmp.ne.s32.totalorder %s3036_s1, %s2182_s18  ;;  %p2189_p11 = scmp.lt.u32.totalorder %s2182_s18, %s3036_s1 }
  0x23   : > { %p2185_p9 = pnand %p2623_p8, %p2183_p7 }
  0x25   : > { %p2186_p10 = pneg %p2185_p9 }
  0x27   : > { %p2191_p12 = pnand %p2189_p11, %p2186_p10 }
  0x29   : > { %2194 = shalt.err (!%p2191_p12)
}
  0x2a   : > { %s2195_s16 = scalar_lea.vmem %s2596_s26, 4096  ;;  %p2203_p5 = scmp.lt.s32.totalorder %s2596_s26, %s2596_s26 }
  0x2b   : > { %p2196_p13 = scmp.ne.s32.totalorder %s2596_s26, %s2195_s16  ;;  %p2204_p4 = scmp.lt.s32.totalorder %s2195_s16, %s2195_s16 }
  0x2d   : > { %p2198_p0 = pnand %p2196_p13, %p2623_p8  ;;  %p2205_p7 = por %p2204_p4, %p2203_p5 }
  0x2f   : > { %p2199_p2 = pneg %p2198_p0 }
  0x31   : > { %p2206_p9 = pnand %p2205_p7, %p2199_p2 }
  0x33   : > { %2209 = shalt.err (!%p2206_p9)
}
  0x34   : > { %s2495_s17 = smov 128   ;;  %s2496_s18 = smov 8  }
  0x35   : > { %1943 = dma.hbm_to_vmem [thread:$0]  (!%p2607_p6), %s3036_s1, 4096, %s2596_s26, [#allocation6], %s2495_s17, %s2495_s17, %s2496_s18  }
  0x36   : > { %s2210_s16 = scalar_lea.hbm %s3009_s5, 4096 }
  0x37   : > { %p2211_p4 = scmp.ne.s32.totalorder %s3009_s5, %s2210_s16  ;;  %p2217_p12 = scmp.lt.u32.totalorder %s2210_s16, %s3009_s5 }
  0x39   : > { %p2213_p10 = pnand %p2211_p4, %p2623_p8 }
  0x3b   : > { %p2214_p11 = pneg %p2213_p10 }
  0x3d   : > { %p2219_p13 = pnand %p2217_p12, %p2214_p11 }
  0x3f   : > { %2222 = shalt.err (!%p2219_p13)
}
  0x40   : > { %s2223_s26 = scalar_lea.vmem %s2611_s30, 4096  ;;  %p2231_p7 = scmp.lt.s32.totalorder %s2611_s30, %s2611_s30 }
  0x41   : > { %p2224_p0 = scmp.ne.s32.totalorder %s2611_s30, %s2223_s26  ;;  %p2232_p9 = scmp.lt.s32.totalorder %s2223_s26, %s2223_s26 }
  0x43   : > { %p2226_p2 = pnand %p2224_p0, %p2623_p8  ;;  %p2233_p4 = por %p2232_p9, %p2231_p7 }
  0x45   : > { %p2227_p5 = pneg %p2226_p2 }
  0x47   : > { %p2234_p10 = pnand %p2233_p4, %p2227_p5 }
  0x49   : > { %2237 = shalt.err (!%p2234_p10)
}
  0x4a   : > { %1949 = dma.hbm_to_vmem [thread:$0]  (!%p2607_p6), %s3009_s5, 4096, %s2611_s30, [#allocation9], %s2495_s17, %s2495_s17, %s2496_s18  }
  0x4b   : > { %s3038_s3 = sld [smem:[#allocation26_spill]] }
  0x51   : > { %s2238_s19 = scalar_lea.hbm %s3038_s3, 4096 }
  0x52   : > { %p2239_p11 = scmp.ne.s32.totalorder %s3038_s3, %s2238_s19  ;;  %p2245_p0 = scmp.lt.u32.totalorder %s2238_s19, %s3038_s3 }
  0x54   : > { %p2241_p12 = pnand %p2239_p11, %p2623_p8 }
  0x56   : > { %p2242_p13 = pneg %p2241_p12 }
  0x58   : > { %p2247_p2 = pnand %p2245_p0, %p2242_p13 }
  0x5a   : > { %2250 = shalt.err (!%p2247_p2)
}
  0x5b   : > { %s2251_s30 = scalar_lea.vmem %s2613_s15, 4096  ;;  %p2259_p4 = scmp.lt.s32.totalorder %s2613_s15, %s2613_s15 }
  0x5c   : > { %p2252_p5 = scmp.ne.s32.totalorder %s2613_s15, %s2251_s30  ;;  %p2260_p10 = scmp.lt.s32.totalorder %s2251_s30, %s2251_s30 }
  0x5e   : > { %p2254_p7 = pnand %p2252_p5, %p2623_p8  ;;  %p2261_p11 = por %p2260_p10, %p2259_p4 }
  0x60   : > { %p2255_p9 = pneg %p2254_p7 }
  0x62   : > { %p2262_p12 = pnand %p2261_p11, %p2255_p9 }
  0x64   : > { %2265 = shalt.err (!%p2262_p12)
}
  0x65   : > { %1946 = dma.hbm_to_vmem [thread:$0]  (!%p2607_p6), %s3038_s3, 4096, %s2613_s15, [#allocation6], %s2495_s17, %s2495_s17, %s2496_s18  }
  0x66   : > { %s2497_s9 = smov [#allocation10]   ;;  %s2266_s20 = scalar_lea.hbm %s3011_s7, 2048 }
  0x67   : > { %s400_s11 = sshll.u32 %s2497_s9, 4  ;;  %p2267_p13 = scmp.ne.s32.totalorder %s3011_s7, %s2266_s20  ;;  %s401_s11 = int_to_ptr.vmem [resolvable:$true] %s400_s11 }
  0x68   : > { %p2273_p5 = scmp.lt.u32.totalorder %s2266_s20, %s3011_s7 }
  0x69   : > { %p2269_p0 = pnand %p2267_p13, %p2623_p8 }
  0x6b   : > { %p2270_p2 = pneg %p2269_p0 }
  0x6d   : > { %p2275_p7 = pnand %p2273_p5, %p2270_p2 }
  0x6f   : > { %2278 = shalt.err (!%p2275_p7)
}
  0x70   : > { %s2279_s15 = scalar_lea.vmem %s401_s11, 2048  ;;  %p2287_p11 = scmp.lt.s32.totalorder %s401_s11, %s401_s11 }
  0x71   : > { %p2280_p9 = scmp.ne.s32.totalorder %s401_s11, %s2279_s15  ;;  %p2288_p12 = scmp.lt.s32.totalorder %s2279_s15, %s2279_s15 }
  0x73   : > { %p2282_p4 = pnand %p2280_p9, %p2623_p8  ;;  %p2289_p1 = por %p2288_p12, %p2287_p11 }
  0x75   : > { %p2283_p10 = pneg %p2282_p4 }
  0x77   : > { %p2290_p3 = pnand %p2289_p1, %p2283_p10 }
  0x79   : > { %2293 = shalt.err (!%p2290_p3)
}
  0x7a   : > { %s2498_s17 = smov 64   ;;  %s2499_s25 = smov 4  }
  0x7b   : > { %1952 = dma.hbm_to_vmem [thread:$0]  (!%p2607_p6), %s3011_s7, 2048, %s401_s11, [#allocation9], %s2498_s17, %s2498_s17, %s2499_s25  }
  0x7c   : > { %s3022_s8 = sadd.s32 4294967294, %s2490_s24   ;;  %s2719_s9 = sadd.s32 1, %s2490_s24  }
  0x7d   : > { %s41_s12 = ssub.s32 %s2490_s24, %s2719_s9  ;;  %s44_s19 = sadd.s32 1, %s2486_s23 }
  0x7e   : > { %p42_p1 = scmp.eq.s32.totalorder %s41_s12, 0  ;;  %p51_p3 = scmp.ne.s32.totalorder %s2486_s23, %s2482_s22 }
  0x7f   : > { %p52_p8 = scmp.eq.s32.totalorder %s2490_s24, 0  ;;  %p57_p13 = scmp.ne.s32.totalorder %s2482_s22, %s2478_s21 }
  0x80   : > { %s2730_s20 = scalar_select %p42_p1, %s2486_s23, %s44_s19  }
  0x81   : > { %p2732_p0 = por %p52_p8, %p51_p3  ;;  %p3040_p2 = scmp.eq.s32.totalorder %s2591_s27, 0 }
  0x82   : > { %p249_p5 = scmp.eq.s32.totalorder %s2591_s27, 1  ;;  %p255_p7 = scmp.eq.s32.totalorder %s3022_s8, 1 }
  0x83   : > { %p2738_p6 = por %p3040_p2, %p57_p13  ;;  %p1974_p9 = scmp.lt.s32.totalorder %s2490_s24, 2 }
  0x84   : > { %s417_s29 = sand.u32 1, %s2486_s23   ;;  %p2747_p4 = por %p249_p5, %p51_p3 }
  0x85   : > { %p2751_p10 = por %p255_p7, %p57_p13  ;;  %s1743_s30 = sshll.u32 %s417_s29, 3 }
  0x86   : > { %s3042_s14 = scalar_select %p2747_p4, 1, 0 }
  0x87   : > { %s3043_s16 = scalar_select %p2751_p10, 1, 0 }
  0x88   : > { %s1886_s15 = sshll.u32 %s2490_s24, 7  ;;  %s3044_s0 = sld [smem:[#allocation23_spill]] }
  0x89   : > { %s421_s26 = scalar_lea.vmem [#allocation2], %s1743_s30  ;;  %p2765_p11 = pnand %p1974_p9, %p2732_p0 }
  0x8a   : > { %s429_s12 = sshll.u32 %s421_s26, 4  ;;  %s418_s8 = scalar_lea.sflag [#allocation3], %s417_s29  ;;  %s2761_s12 = int_to_ptr.vmem [resolvable:$true] %s429_s12 }
  0x8b   : > { %p2296_p1 = pneg %p2765_p11 }
  0x8e   : > { %s2759_s18 = scalar_lea.hbm %s3044_s0, %s1886_s15  ;;  %s2299_s17 = scalar_lea.hbm %s3044_s0, 256 }
  0x8f   : > { %s2294_s1 = scalar_lea.hbm %s2759_s18, 128  ;;  %p2300_p13 = scmp.lt.u32.totalorder %s2759_s18, %s3044_s0 }
  0x90   : > { %p2295_p12 = scmp.ne.s32.totalorder %s2759_s18, %s2294_s1  ;;  %p2301_p0 = scmp.lt.u32.totalorder %s2299_s17, %s2294_s1 }
  0x91   : > { %p2303_p5 = scmp.lt.u32.totalorder %s2294_s1, %s2759_s18 }
  0x92   : > { %p2297_p3 = pnand %p2296_p1, %p2295_p12  ;;  %p2302_p2 = por %p2301_p0, %p2300_p13 }
  0x94   : > { %p2298_p8 = pneg %p2297_p3  ;;  %p2304_p7 = por %p2303_p5, %p2302_p2 }
  0x96   : > { %p2305_p9 = pnand %p2304_p7, %p2298_p8 }
  0x98   : > { %2308 = shalt.err (!%p2305_p9)
}
  0x99   : > { %s2309_s29 = scalar_lea.vmem %s2761_s12, 128  ;;  %s2500_s26 = smov [#allocation2]  }
  0x9a   : > { %p2310_p12 = scmp.ne.s32.totalorder %s2761_s12, %s2309_s29  ;;  %s2314_s30 = sshll.u32 %s2500_s26, 4  ;;  %s2315_s30 = int_to_ptr.vmem [resolvable:$false] %s2314_s30 }
  0x9b   : > { %s2316_s15 = scalar_lea.vmem %s2315_s30, 256  ;;  %p2317_p4 = scmp.lt.s32.totalorder %s2761_s12, %s2315_s30 }
  0x9c   : > { %p2312_p3 = pnand %p2310_p12, %p2296_p1  ;;  %p2318_p13 = scmp.lt.s32.totalorder %s2316_s15, %s2309_s29 }
  0x9e   : > { %p2313_p10 = pneg %p2312_p3  ;;  %p2319_p0 = por %p2318_p13, %p2317_p4 }
  0xa0   : > { %p2320_p2 = pnand %p2319_p0, %p2313_p10 }
  0xa2   : > { %2323 = shalt.err (!%p2320_p2)
}
  0xa3   : > { %1956 = dma.hbm_to_vmem [thread:$0]  (!%p2765_p11), %s2759_s18, 128, %s2761_s12, %s418_s8  }
  0xa4   : > { %p3046_p8 = scmp.ne.s32.totalorder %s3034_s28, 0 }
  0xa5   : > { %s2797_s1 = sand.u32 (!%p3046_p8), 1, %s2482_s22  }
  0xa6   : > { %438 = sbr.rel (%p3046_p8) target bundleno = 1136 (0x470), region = 56  ;;  %s2800_s17 = sshll.u32 (!%p3046_p8), %s2797_s1, 3 }
  0xa7   : > { %s441_s13 = scalar_lea.sflag (!%p3046_p8), [#allocation3], %s2797_s1  ;;  %s444_s25 = scalar_lea.vmem (!%p3046_p8), [#allocation2], %s2800_s17 }
  0xad   : > { %2453 = dma.done.wait (%p2738_p6), %s441_s13, 128  }
  0xae   : > { %2455 = vsyncadd (%p2738_p6), %s441_s13, 4294967168  ;;  %p3047_p4 = scmp.eq.s32.totalorder %s2591_s27, 0 }
  0xb0   : > { %2457 = dma.done.wait (%p3047_p4), [#allocation6], 8192   ;;  %p3048_p10 = pmov %p3047_p4 }
  0xb1   : > { %p3049_p11 = pmov %p3047_p4 }
  0xb2   : > { %2459 = vsyncadd (%p3048_p10), [#allocation6], 4294959104 }
  0xb3   : > { %2461 = dma.done.wait (%p3049_p11), [#allocation9], 6144   ;;  %p3050_p1 = pmov %p3047_p4 }
  0xb4   : > { %v2020_v0 = vld [vmem:[#allocation5 + $0x4] ss:$8 sps:$4 sm:$0xff]   ;;  %v2022_v1 = vld [vmem:[#allocation5] ss:$8 sps:$4 sm:$0xff]   ;;  %v2023_v2 = vld [vmem:[#allocation5 + $0x14] ss:$8 sps:$4 sm:$0xff]  }
  0xb5   : > { %2463 = vsyncadd (%p3050_p1), [#allocation9], 4294961152  ;;  %729 = vmatprep.subr.bf16.mxu0 %v2020_v0  ;;  %v2025_v3 = vld [vmem:[#allocation5 + $0x10] ss:$8 sps:$4 sm:$0xff]   ;;  %v2026_v4 = vld [vmem:[#allocation5 + $0x24] ss:$8 sps:$4 sm:$0xff]  }
  0xb6   : > { %730 = vmatpush1.bf16.msra.mxu0 %v2022_v1  ;;  %v2028_v5 = vld [vmem:[#allocation5 + $0x20] ss:$8 sps:$4 sm:$0xff]   ;;  %v2029_v6 = vld [vmem:[#allocation5 + $0x34] ss:$8 sps:$4 sm:$0xff]   ;;  %v2031_v7 = vld [vmem:[#allocation5 + $0x30] ss:$8 sps:$4 sm:$0xff]  }
  0xb7   : > { %731 = vmatprep.subr.bf16.mxu0 %v2023_v2  ;;  %v2032_v8 = vld [vmem:[#allocation5 + $0x44] ss:$8 sps:$4 sm:$0xff]   ;;  %v2034_v9 = vld [vmem:[#allocation5 + $0x40] ss:$8 sps:$4 sm:$0xff]   ;;  %v2035_v10 = vld [vmem:[#allocation5 + $0x54] ss:$8 sps:$4 sm:$0xff]  }
  0xb8   : > { %v2037_v11 = vld [vmem:[#allocation5 + $0x50] ss:$8 sps:$4 sm:$0xff]   ;;  %v2038_v12 = vld [vmem:[#allocation5 + $0x64] ss:$8 sps:$4 sm:$0xff]   ;;  %v2040_v13 = vld [vmem:[#allocation5 + $0x60] ss:$8 sps:$4 sm:$0xff]  }
  0xb9   : > { %v2818_v14 = vld [vmem:[%s444_s25] sm:$0xff]  ;;  %v2070_v16 = vld [vmem:[#allocation7 + $0x4] ss:$8 sps:$4 sm:$0xff]   ;;  %v2072_v17 = vld [vmem:[#allocation7] ss:$8 sps:$4 sm:$0xff]   ;;  %s3051_s2 = sld [smem:[#allocation25_spill]] }
  0xba   : > { %732 = vmatpush1.bf16.msra.mxu0 %v2025_v3  ;;  %v1757_v15 = vcombine.high %v2818_v14, %v2818_v14  ;;  %v2073_v18 = vld [vmem:[#allocation7 + $0x14] ss:$8 sps:$4 sm:$0xff]   ;;  %985 = vmatprep.subr.bf16.mxu1 %v2070_v16  ;;  %v2043_v20 = vld [vmem:[#allocation5 + $0x70] ss:$8 sps:$4 sm:$0xff]   ;;  %v2076_v22 = vld [vmem:[#allocation7 + $0x24] ss:$8 sps:$4 sm:$0xff]   ;;  %v1756_v56 = vcombine.low %v2818_v14, %v2818_v14 }
  0xbb   : > { %733 = vmatprep.subr.bf16.mxu0 %v2026_v4  ;;  %v2041_v19 = vld [vmem:[#allocation5 + $0x74] ss:$8 sps:$4 sm:$0xff]   ;;  %986 = vmatpush1.bf16.msra.mxu1 %v2072_v17  ;;  %v2075_v21 = vld [vmem:[#allocation7 + $0x10] ss:$8 sps:$4 sm:$0xff]   ;;  %v2044_v23 = vld [vmem:[#allocation5 + $0x84] ss:$8 sps:$4 sm:$0xff]  }
  0xbc   : > { %761 = vmatprep.mubr.bf16.mxu0 %v1757_v15  ;;  %987 = vmatprep.subr.bf16.mxu1 %v2073_v18  ;;  %v2046_v24 = vld [vmem:[#allocation5 + $0x80] ss:$8 sps:$4 sm:$0xff]   ;;  %v2079_v26 = vld [vmem:[#allocation7 + $0x34] ss:$8 sps:$4 sm:$0xff]   ;;  %v2049_v28 = vld [vmem:[#allocation5 + $0x90] ss:$8 sps:$4 sm:$0xff]  }
  0xbd   : > { %v2078_v25 = vld [vmem:[#allocation7 + $0x20] ss:$8 sps:$4 sm:$0xff]   ;;  %v2047_v27 = vld [vmem:[#allocation5 + $0x94] ss:$8 sps:$4 sm:$0xff]   ;;  %v2081_v29 = vld [vmem:[#allocation7 + $0x30] ss:$8 sps:$4 sm:$0xff]  }
  0xbe   : > { %734 = vmatpush1.bf16.msra.mxu0 %v2028_v5  ;;  %v2082_v30 = vld [vmem:[#allocation7 + $0x44] ss:$8 sps:$4 sm:$0xff]   ;;  %v2052_v32 = vld [vmem:[#allocation5 + $0xa0] ss:$8 sps:$4 sm:$0xff]   ;;  %v2085_v34 = vld [vmem:[#allocation7 + $0x54] ss:$8 sps:$4 sm:$0xff]  }
  0xbf   : > { %735 = vmatprep.subr.bf16.mxu0 %v2029_v6  ;;  %988 = vmatpush1.bf16.msra.mxu1 %v2075_v21  ;;  %v2050_v31 = vld [vmem:[#allocation5 + $0xa4] ss:$8 sps:$4 sm:$0xff]   ;;  %v2084_v33 = vld [vmem:[#allocation7 + $0x40] ss:$8 sps:$4 sm:$0xff]   ;;  %v2053_v35 = vld [vmem:[#allocation5 + $0xb4] ss:$8 sps:$4 sm:$0xff]  }
  0xc0   : > { %989 = vmatprep.subr.bf16.mxu1 %v2076_v22  ;;  %v2087_v36 = vld [vmem:[#allocation7 + $0x50] ss:$8 sps:$4 sm:$0xff]   ;;  %v2088_v38 = vld [vmem:[#allocation7 + $0x64] ss:$8 sps:$4 sm:$0xff]   ;;  %v2090_v40 = vld [vmem:[#allocation7 + $0x60] ss:$8 sps:$4 sm:$0xff]  }
  0xc1   : > { %v2055_v37 = vld [vmem:[#allocation5 + $0xb0] ss:$8 sps:$4 sm:$0xff]   ;;  %v2056_v39 = vld [vmem:[#allocation5 + $0xc4] ss:$8 sps:$4 sm:$0xff]   ;;  %v2058_v41 = vld [vmem:[#allocation5 + $0xc0] ss:$8 sps:$4 sm:$0xff]  }
  0xc2   : > { %736 = vmatpush1.bf16.msra.mxu0 %v2031_v7  ;;  %v2091_v42 = vld [vmem:[#allocation7 + $0x74] ss:$8 sps:$4 sm:$0xff]   ;;  %v2093_v44 = vld [vmem:[#allocation7 + $0x70] ss:$8 sps:$4 sm:$0xff]   ;;  %v2094_v46 = vld [vmem:[#allocation7 + $0x84] ss:$8 sps:$4 sm:$0xff]  }
  0xc3   : > { %737 = vmatprep.subr.bf16.mxu0 %v2032_v8  ;;  %990 = vmatpush1.bf16.msra.mxu1 %v2078_v25  ;;  %v2059_v43 = vld [vmem:[#allocation5 + $0xd4] ss:$8 sps:$4 sm:$0xff]   ;;  %v2061_v45 = vld [vmem:[#allocation5 + $0xd0] ss:$8 sps:$4 sm:$0xff]   ;;  %v2062_v47 = vld [vmem:[#allocation5 + $0xe4] ss:$8 sps:$4 sm:$0xff]  }
  0xc4   : > { %991 = vmatprep.subr.bf16.mxu1 %v2079_v26  ;;  %v2096_v48 = vld [vmem:[#allocation7 + $0x80] ss:$8 sps:$4 sm:$0xff]   ;;  %v2097_v50 = vld [vmem:[#allocation7 + $0x94] ss:$8 sps:$4 sm:$0xff]   ;;  %v2099_v52 = vld [vmem:[#allocation7 + $0x90] ss:$8 sps:$4 sm:$0xff]  }
  0xc5   : > { %v2064_v49 = vld [vmem:[#allocation5 + $0xe0] ss:$8 sps:$4 sm:$0xff]   ;;  %v2065_v51 = vld [vmem:[#allocation5 + $0xf4] ss:$8 sps:$4 sm:$0xff]   ;;  %v2067_v53 = vld [vmem:[#allocation5 + $0xf0] ss:$8 sps:$4 sm:$0xff]  }
  0xc6   : > { %738 = vmatpush1.bf16.msra.mxu0 %v2034_v9  ;;  %v2100_v54 = vld [vmem:[#allocation7 + $0xa4] ss:$8 sps:$4 sm:$0xff]   ;;  %v2102_v55 = vld [vmem:[#allocation7 + $0xa0] ss:$8 sps:$4 sm:$0xff]   ;;  %v2103_v57 = vld [vmem:[#allocation7 + $0xb4] ss:$8 sps:$4 sm:$0xff]  }
  0xc7   : > { %739 = vmatprep.subr.bf16.mxu0 %v2035_v10  ;;  %992 = vmatpush1.bf16.msra.mxu1 %v2081_v29  ;;  %v2105_v58 = vld [vmem:[#allocation7 + $0xb0] ss:$8 sps:$4 sm:$0xff]   ;;  %v2106_v59 = vld [vmem:[#allocation7 + $0xc4] ss:$8 sps:$4 sm:$0xff]   ;;  %v2108_v60 = vld [vmem:[#allocation7 + $0xc0] ss:$8 sps:$4 sm:$0xff]  }
  0xc8   : > { %993 = vmatprep.subr.bf16.mxu1 %v2082_v30  ;;  %v2109_v61 = vld [vmem:[#allocation7 + $0xd4] ss:$8 sps:$4 sm:$0xff]   ;;  %v2111_v62 = vld [vmem:[#allocation7 + $0xd0] ss:$8 sps:$4 sm:$0xff]   ;;  %v2112_v63 = vld [vmem:[#allocation7 + $0xe4] ss:$8 sps:$4 sm:$0xff]  }
  0xc9   : > { %v2114_v0 = vld [vmem:[#allocation7 + $0xe0] ss:$8 sps:$4 sm:$0xff]   ;;  %v2115_v1 = vld [vmem:[#allocation7 + $0xf4] ss:$8 sps:$4 sm:$0xff]   ;;  %v2117_v2 = vld [vmem:[#allocation7 + $0xf0] ss:$8 sps:$4 sm:$0xff]  }
  0xca   : > { %740 = vmatpush1.bf16.msra.mxu0 %v2037_v11  ;;  %v2118_v3 = vld [vmem:[#allocation8] ss:$8 sps:$4 sm:$0xff]   ;;  %v2120_v4 = vld [vmem:[#allocation8 + $0x4] ss:$8 sps:$4 sm:$0xff]   ;;  %v2123_v5 = vld [vmem:[#allocation8 + $0x14] ss:$8 sps:$4 sm:$0xff]  }
  0xcb   : > { %741 = vmatprep.subr.bf16.mxu0 %v2038_v12  ;;  %994 = vmatpush1.bf16.msra.mxu1 %v2084_v33  ;;  %v2121_v6 = vld [vmem:[#allocation8 + $0x10] ss:$8 sps:$4 sm:$0xff]   ;;  %v2126_v7 = vld [vmem:[#allocation8 + $0x24] ss:$8 sps:$4 sm:$0xff]   ;;  %v2124_v8 = vld [vmem:[#allocation8 + $0x20] ss:$8 sps:$4 sm:$0xff]  }
  0xcc   : > { %995 = vmatprep.subr.bf16.mxu1 %v2085_v34  ;;  %v2129_v9 = vld [vmem:[#allocation8 + $0x34] ss:$8 sps:$4 sm:$0xff]   ;;  %v2127_v10 = vld [vmem:[#allocation8 + $0x30] ss:$8 sps:$4 sm:$0xff]   ;;  %v2132_v11 = vld [vmem:[#allocation8 + $0x44] ss:$8 sps:$4 sm:$0xff]  }
  0xcd   : > { %v2130_v12 = vld [vmem:[#allocation8 + $0x40] ss:$8 sps:$4 sm:$0xff]   ;;  %v2133_v14 = vld [vmem:[#allocation8 + $0x50] ss:$8 sps:$4 sm:$0xff]   ;;  %v2138_v15 = vld [vmem:[#allocation8 + $0x64] ss:$8 sps:$4 sm:$0xff]  }
  0xce   : > { %742 = vmatpush1.bf16.msra.mxu0 %v2040_v13  ;;  %v2135_v13 = vld [vmem:[#allocation8 + $0x54] ss:$8 sps:$4 sm:$0xff]   ;;  %v2136_v16 = vld [vmem:[#allocation8 + $0x60] ss:$8 sps:$4 sm:$0xff]   ;;  %v2139_v18 = vld [vmem:[#allocation8 + $0x70] ss:$8 sps:$4 sm:$0xff]  }
  0xcf   : > { %743 = vmatprep.subr.bf16.mxu0 %v2041_v19  ;;  %996 = vmatpush1.bf16.msra.mxu1 %v2087_v36  ;;  %v2141_v17 = vld [vmem:[#allocation8 + $0x74] ss:$8 sps:$4 sm:$0xff]   ;;  %v2144_v19 = vld [vmem:[#allocation8 + $0x84] ss:$8 sps:$4 sm:$0xff]   ;;  %v2145_v22 = vld [vmem:[#allocation8 + $0x90] ss:$8 sps:$4 sm:$0xff]  }
  0xd0   : > { %997 = vmatprep.subr.bf16.mxu1 %v2088_v38  ;;  %v2147_v21 = vld [vmem:[#allocation8 + $0x94] ss:$8 sps:$4 sm:$0xff]   ;;  %v2151_v26 = vld [vmem:[#allocation8 + $0xb0] ss:$8 sps:$4 sm:$0xff]   ;;  %s3024_s11 = scalar_lea.vmem [#allocation11], %s2800_s17  ;;  %s3052_s4 = sld [smem:[#allocation27_spill]] }
  0xd1   : > { %v2153_v25 = vld [vmem:[#allocation8 + $0xb4] ss:$8 sps:$4 sm:$0xff]   ;;  %v2157_v30 = vld [vmem:[#allocation8 + $0xd0] ss:$8 sps:$4 sm:$0xff]   ;;  %s501_s19 = scalar_lea.vmem [#allocation12], %s2800_s17  ;;  %s1754_s30 = sshll.u32 %s2797_s1, 4 }
  0xd2   : > { %744 = vmatpush1.bf16.msra.mxu0 %v2043_v20  ;;  %v2142_v20 = vld [vmem:[#allocation8 + $0x80] ss:$8 sps:$4 sm:$0xff]   ;;  %v2159_v29 = vld [vmem:[#allocation8 + $0xd4] ss:$8 sps:$4 sm:$0xff]   ;;  %v550_v34 = vld [vmem:[%s3051_s2] sm:$0x3] }
  0xd3   : > { %745 = vmatprep.subr.bf16.mxu0 %v2044_v23  ;;  %998 = vmatpush1.bf16.msra.mxu1 %v2090_v40  ;;  %v2150_v23 = vld [vmem:[#allocation8 + $0xa4] ss:$8 sps:$4 sm:$0xff]   ;;  %s508_s15 = scalar_lea.vmem [#allocation14], %s1754_s30  ;;  %s1469_s25 = sand.u32 1, %s2591_s27  }
  0xd4   : > { %999 = vmatprep.subr.bf16.mxu1 %v2091_v42  ;;  %s1522_s13 = sshll.u32 %s508_s15, 4  ;;  %s2854_s28 = sshll.u32 %s2591_s27, 7  ;;  %s2850_s13 = int_to_ptr.vmem [resolvable:$true] %s1522_s13 }
  0xd5   : > { %s2860_s12 = scalar_lea.hbm %s3014_s10, %s2854_s28  ;;  %s1508_s29 = sshll.u32 %s501_s19, 4  ;;  %s2864_s29 = int_to_ptr.vmem [resolvable:$true] %s1508_s29 }
  0xd6   : > { %746 = vmatpush1.bf16.msra.mxu0 %v2046_v24  ;;  %v2148_v24 = vld [vmem:[#allocation8 + $0xa0] ss:$8 sps:$4 sm:$0xff]   ;;  %s2872_s0 = scalar_lea.sflag [#allocation13], %s1469_s25  ;;  %s2324_s2 = scalar_lea.vmem %s2864_s29, 128 }
  0xd7   : > { %747 = vmatprep.subr.bf16.mxu0 %v2047_v27  ;;  %1000 = vmatpush1.bf16.msra.mxu1 %v2093_v44  ;;  %v2156_v27 = vld [vmem:[#allocation8 + $0xc4] ss:$8 sps:$4 sm:$0xff]   ;;  %p2325_p6 = scmp.ne.s32.totalorder %s2864_s29, %s2324_s2  ;;  %p3054_p5 = scmp.ne.s32.totalorder %s3042_s14, 0 }
  0xd8   : > { %1001 = vmatprep.subr.bf16.mxu1 %v2094_v46  ;;  %s2501_s8 = smov [#allocation12]  }
  0xd9   : > { %p2326_p7 = pnand %p2325_p6, %p3054_p5  ;;  %s2328_s18 = sshll.u32 %s2501_s8, 4  ;;  %s2329_s18 = int_to_ptr.vmem [resolvable:$false] %s2328_s18 }
  0xda   : > { %748 = vmatpush1.bf16.msra.mxu0 %v2049_v28  ;;  %v2154_v28 = vld [vmem:[#allocation8 + $0xc0] ss:$8 sps:$4 sm:$0xff]   ;;  %p2331_p12 = scmp.lt.s32.totalorder %s2864_s29, %s2329_s18 }
  0xdb   : > { %749 = vmatprep.subr.bf16.mxu0 %v2050_v31  ;;  %1002 = vmatpush1.bf16.msra.mxu1 %v2096_v48  ;;  %v552_v31 = vlaneseq  ;;  %p2327_p9 = pneg %p2326_p7 }
  0xdc   : > { %1003 = vmatprep.subr.bf16.mxu1 %v2097_v50  ;;  %v2160_v50 = vld [vmem:[#allocation8 + $0xe0] ss:$8 sps:$4 sm:$0xff]  }
  0xde   : > { %750 = vmatpush1.bf16.msra.mxu0 %v2052_v32  ;;  %v553_v32 = vshrl.u32 %v552_v31, 7 }
  0xdf   : > { %751 = vmatprep.subr.bf16.mxu0 %v2053_v35  ;;  %1004 = vmatpush1.bf16.msra.mxu1 %v2099_v52  ;;  %v2163_v52 = vld [vmem:[#allocation8 + $0xf0] ss:$8 sps:$4 sm:$0xff]  }
  0xe0   : > { %1005 = vmatprep.subr.bf16.mxu1 %v2100_v54  ;;  %v2824_v33 = vsub.s32 0, %v553_v32  ;;  %v2829_v35 = vsub.s32 1, %v553_v32  ;;  %v2167_v54 = vld [vmem:[#allocation10] sm:$0xff]  }
  0xe2   : > { %752 = vmatpush1.bf16.msra.mxu0 %v2055_v37  ;;  %v555_v36 = vrot.slane %v550_v34, %v2824_v33  ;;  %v559_v37 = vrot.slane %v550_v34, %v2829_v35 }
  0xe3   : > { %753 = vmatprep.subr.bf16.mxu0 %v2056_v39  ;;  %1006 = vmatpush1.bf16.msra.mxu1 %v2102_v55  ;;  %v2168_v55 = vld [vmem:[#allocation10 + $0x48] sm:$0xff]  }
  0xe4   : > { %1007 = vmatprep.subr.bf16.mxu1 %v2103_v57  ;;  %v2170_v57 = vld [vmem:[#allocation10 + $0x50] sm:$0xff]  }
  0xe6   : > { %754 = vmatpush1.bf16.msra.mxu0 %v2058_v41 }
  0xe7   : > { %755 = vmatprep.subr.bf16.mxu0 %v2059_v43  ;;  %1008 = vmatpush1.bf16.msra.mxu1 %v2105_v58  ;;  %v2171_v58 = vld [vmem:[#allocation10 + $0x10] sm:$0xff]  }
  0xe8   : > { %1009 = vmatprep.subr.bf16.mxu1 %v2106_v59  ;;  %v2172_v59 = vld [vmem:[#allocation10 + $0x58] sm:$0xff]  }
  0xea   : > { %756 = vmatpush1.bf16.msra.mxu0 %v2061_v45 }
  0xeb   : > { %757 = vmatprep.subr.bf16.mxu0 %v2062_v47  ;;  %1010 = vmatpush1.bf16.msra.mxu1 %v2108_v60  ;;  %v2173_v60 = vld [vmem:[#allocation10 + $0x18] sm:$0xff]  }
  0xec   : > { %1011 = vmatprep.subr.bf16.mxu1 %v2109_v61  ;;  %v2174_v61 = vld [vmem:[#allocation10 + $0x60] sm:$0xff]  }
  0xee   : > { %758 = vmatpush1.bf16.msra.mxu0 %v2064_v49  ;;  %v2162_v49 = vld [vmem:[#allocation8 + $0xe4] ss:$8 sps:$4 sm:$0xff]  }
  0xef   : > { %759 = vmatprep.subr.bf16.mxu0 %v2065_v51  ;;  %1012 = vmatpush1.bf16.msra.mxu1 %v2111_v62  ;;  %v2165_v51 = vld [vmem:[#allocation8 + $0xf4] ss:$8 sps:$4 sm:$0xff]   ;;  %v2175_v62 = vld [vmem:[#allocation10 + $0x20] sm:$0xff]  }
  0xf0   : > { %1013 = vmatprep.subr.bf16.mxu1 %v2112_v63  ;;  %v2176_v63 = vld [vmem:[#allocation10 + $0x68] sm:$0xff]  }
  0xf2   : > { %760 = vmatpush1.bf16.msra.mxu0 %v2067_v53  ;;  %v2166_v53 = vld [vmem:[#allocation10 + $0x40] sm:$0xff]  }
  0xf3   : > { %1014 = vmatpush1.bf16.msra.mxu1 %v2114_v0  ;;  %1241 = vmatprep.subr.bf16.mxu0 %v2120_v4  ;;  %v2177_v0 = vld [vmem:[#allocation10 + $0x28] sm:$0xff]  }
  0xf4   : > { %1015 = vmatprep.subr.bf16.mxu1 %v2115_v1  ;;  %v813_v1 = vld [vmem:[%s3052_s4] sm:$0x3] }
  0xf5   : > { %762 = vmatmul.mubr.bf16.vlgmr.msra.gmra.mrb[0].mxu0 %v1756_v56  ;;  %v2169_v56 = vld [vmem:[#allocation10 + $0x8] sm:$0xff]  }
  0xf6   : > { %1242 = vmatpush1.bf16.msra.mxu0 %v2118_v3  ;;  %v822_v3 = vrot.slane %v813_v1, %v2829_v35 }
  0xf7   : > { %1016 = vmatpush1.bf16.msra.mxu1 %v2117_v2  ;;  %1243 = vmatprep.subr.bf16.mxu0 %v2123_v5  ;;  %v818_v2 = vrot.slane %v813_v1, %v2824_v33 }
  0xf8   : > { %1892 = vmatprep.subr.bf16.mxu1 %v2166_v53 }
  0xfa   : > { %1244 = vmatpush1.bf16.msra.mxu0 %v2121_v6 }
  0xfb   : > { %1245 = vmatprep.subr.bf16.mxu0 %v2126_v7 }
  0xfe   : > { %1246 = vmatpush1.bf16.msra.mxu0 %v2124_v8 }
  0xff   : > { %1247 = vmatprep.subr.bf16.mxu0 %v2129_v9 }
 0x102   : > { %1248 = vmatpush1.bf16.msra.mxu0 %v2127_v10 }
 0x103   : > { %1249 = vmatprep.subr.bf16.mxu0 %v2132_v11 }
 0x106   : > { %1250 = vmatpush1.bf16.msra.mxu0 %v2130_v12 }
 0x107   : > { %1251 = vmatprep.subr.bf16.mxu0 %v2135_v13 }
 0x10a   : > { %1252 = vmatpush1.bf16.msra.mxu0 %v2133_v14 }
 0x10b   : > { %1253 = vmatprep.subr.bf16.mxu0 %v2138_v15  ;;  %v2178_v15 = vld [vmem:[#allocation10 + $0x70] sm:$0xff]  }
 0x10e   : > { %1254 = vmatpush1.bf16.msra.mxu0 %v2136_v16  ;;  %v2179_v16 = vld [vmem:[#allocation10 + $0x30] sm:$0xff]  }
 0x10f   : > { %1255 = vmatprep.subr.bf16.mxu0 %v2141_v17  ;;  %v2180_v17 = vld [vmem:[#allocation10 + $0x78] sm:$0xff]  }
 0x112   : > { %1256 = vmatpush1.bf16.msra.mxu0 %v2139_v18  ;;  %v2181_v18 = vld [vmem:[#allocation10 + $0x38] sm:$0xff]  }
 0x113   : > { %1257 = vmatprep.subr.bf16.mxu0 %v2144_v19  ;;  %v1069_v19 = vld [vmem:[%s3010_s6] sm:$0x3] }
 0x116   : > { %1258 = vmatpush1.bf16.msra.mxu0 %v2142_v20  ;;  %v1074_v20 = vrot.slane %v1069_v19, %v2824_v33 }
 0x117   : > { %1259 = vmatprep.subr.bf16.mxu0 %v2147_v21  ;;  %v1078_v21 = vrot.slane %v1069_v19, %v2829_v35 }
 0x11a   : > { %1260 = vmatpush1.bf16.msra.mxu0 %v2145_v22 }
 0x11b   : > { %1261 = vmatprep.subr.bf16.mxu0 %v2150_v23 }
 0x11e   : > { %1262 = vmatpush1.bf16.msra.mxu0 %v2148_v24 }
 0x11f   : > { %1263 = vmatprep.subr.bf16.mxu0 %v2153_v25 }
 0x122   : > { %1264 = vmatpush1.bf16.msra.mxu0 %v2151_v26 }
 0x123   : > { %1265 = vmatprep.subr.bf16.mxu0 %v2156_v27 }
 0x126   : > { %1266 = vmatpush1.bf16.msra.mxu0 %v2154_v28 }
 0x127   : > { %1267 = vmatprep.subr.bf16.mxu0 %v2159_v29 }
 0x12a   : > { %1268 = vmatpush1.bf16.msra.mxu0 %v2157_v30 }
 0x12b   : > { %1269 = vmatprep.subr.bf16.mxu0 %v2162_v49 }
 0x12e   : > { %1270 = vmatpush1.bf16.msra.mxu0 %v2160_v50 }
 0x12f   : > { %1271 = vmatprep.subr.bf16.mxu0 %v2165_v51 }
 0x132   : > { %1272 = vmatpush1.bf16.msra.mxu0 %v2163_v52 }
 0x1c8   : > { %v763_v38 = vpop.f32.mrb[0].mxu0 }
 0x1c9   : > { %v764_v39 = vadd.f32 %v763_v38, %v555_v36  ;;  %v765_v40 = vpop.f32.mrb[1].mxu0 }
 0x1ca   : > { %v766_v41 = vadd.f32 %v765_v40, %v559_v37  ;;  %v767_v42 = vpop.f32.mrb[2].mxu0 }
 0x1cb   : > { %v770_v43 = vmax.f32 %v764_v39, 0.0  ;;  %v768_v44 = vpop.f32.mrb[3].mxu0 }
 0x1cc   : > { %v771_v45 = vmax.f32 %v766_v41, 0.0 }
 0x1cd   : > { %v772_v48 = vpack.c.bf16 %v770_v43, %v770_v43 }
 0x1ce   : > { %v1887_v46 = vpack.c.bf16 %v771_v45, %v770_v43  ;;  %v773_v47 = vpack.c.bf16 %v771_v45, %v771_v45 }
 0x1d0   : > { %1017 = vmatprep.mubr.bf16.mxu1 %v773_v47  ;;  %780 = vst [vmem:[%s3024_s11] sm:$0xff] %v1887_v46  ;;  %s3053_s11 = sld [smem:[#allocation29_spill]] }
 0x1d1   : > { %1018 = vmatmul.mubr.bf16.vlgmr.msra.gmra.mrb[0].mxu1 %v772_v48 }
 0x1d2   : > { %1893 = vmatpush3.bf16.msra.mxu1 %v2167_v54 }
 0x1d3   : > { %1894 = vmatprep.subr.bf16.mxu1 %v2168_v55 }
 0x1d6   : > { %1895 = vmatpush3.bf16.msra.mxu1 %v2169_v56 }
 0x1d7   : > { %1896 = vmatprep.subr.bf16.mxu1 %v2170_v57 }
 0x1da   : > { %1897 = vmatpush3.bf16.msra.mxu1 %v2171_v58 }
 0x1db   : > { %1898 = vmatprep.subr.bf16.mxu1 %v2172_v59 }
 0x1de   : > { %1899 = vmatpush3.bf16.msra.mxu1 %v2173_v60 }
 0x1df   : > { %1900 = vmatprep.subr.bf16.mxu1 %v2174_v61 }
 0x1e2   : > { %1901 = vmatpush3.bf16.msra.mxu1 %v2175_v62 }
 0x1e3   : > { %1902 = vmatprep.subr.bf16.mxu1 %v2176_v63 }
 0x1e6   : > { %1903 = vmatpush3.bf16.msra.mxu1 %v2177_v0 }
 0x1e7   : > { %1904 = vmatprep.subr.bf16.mxu1 %v2178_v15 }
 0x1ea   : > { %1905 = vmatpush3.bf16.msra.mxu1 %v2179_v16 }
 0x1eb   : > { %1906 = vmatprep.subr.bf16.mxu1 %v2180_v17 }
 0x1ee   : > { %1907 = vmatpush3.bf16.msra.mxu1 %v2181_v18 }
 0x2a4   : > { %v1019_v4 = vpop.f32.mrb[0].mxu1 }
 0x2a5   : > { %v1020_v5 = vadd.f32 %v1019_v4, %v818_v2  ;;  %v1021_v6 = vpop.f32.mrb[1].mxu1 }
 0x2a6   : > { %v1022_v7 = vadd.f32 %v1021_v6, %v822_v3  ;;  %v1023_v8 = vpop.f32.mrb[2].mxu1 }
 0x2a7   : > { %v1026_v9 = vmax.f32 %v1020_v5, 0.0  ;;  %v1024_v10 = vpop.f32.mrb[3].mxu1 }
 0x2a8   : > { %v1027_v11 = vmax.f32 %v1022_v7, 0.0 }
 0x2a9   : > { %v1028_v14 = vpack.c.bf16 %v1026_v9, %v1026_v9 }
 0x2aa   : > { %v1029_v12 = vpack.c.bf16 %v1027_v11, %v1027_v11  ;;  %v1888_v13 = vpack.c.bf16 %v1027_v11, %v1026_v9 }
 0x2ac   : > { %1273 = vmatprep.mubr.bf16.mxu0 %v1029_v12  ;;  %1036 = vst [vmem:[%s501_s19] sm:$0xff] %v1888_v13  ;;  %s2330_s19 = scalar_lea.vmem %s2329_s18, 256 }
 0x2ad   : > { %1274 = vmatmul.mubr.bf16.vlgmr.msra.gmra.mrb[4].mxu0 %v1028_v14  ;;  %p2332_p3 = scmp.lt.s32.totalorder %s2330_s19, %s2324_s2 }
 0x2af   : > { %p2333_p13 = por %p2332_p3, %p2331_p12 }
 0x2b1   : > { %p2334_p0 = pnand %p2333_p13, %p2327_p9 }
 0x380   : > { %v1275_v22 = vpop.f32.mrb[4].mxu0 }
 0x381   : > { %v1276_v23 = vadd.f32 %v1275_v22, %v1074_v20  ;;  %v1277_v24 = vpop.f32.mrb[5].mxu0 }
 0x382   : > { %v1278_v25 = vadd.f32 %v1277_v24, %v1078_v21  ;;  %v1279_v26 = vpop.f32.mrb[6].mxu0 }
 0x383   : > { %v1282_v27 = vmax.f32 %v1276_v23, 0.0  ;;  %v1280_v28 = vpop.f32.mrb[7].mxu0 }
 0x384   : > { %v1283_v29 = vmax.f32 %v1278_v25, 0.0 }
 0x385   : > { %1284 = vst [vmem:[%s508_s15] sm:$0xff] %v1282_v27  ;;  %v1286_v31 = vpack.c.bf16 %v1282_v27, %v1282_v27 }
 0x386   : > { %1285 = vst [vmem:[%s508_s15 + $0x8] sm:$0xff] %v1283_v29  ;;  %v1287_v30 = vpack.c.bf16 %v1283_v29, %v1283_v29  ;;  %s2870_s15 = scalar_lea.hbm %s3053_s11, %s2854_s28 }
 0x388   : > { %1455 = vmatprep.mubr.bf16.mxu1 %v1287_v30 }
 0x389   : > { %1456 = vmatmul.mubr.bf16.vlgmr.msra.gmra.mrb[4].mxu1 %v1286_v31 }
 0x38a   : > { %2337 = shalt.err (!%p2334_p0)
}
 0x38b   : > { %s2338_s25 = scalar_lea.hbm %s2860_s12, 128  ;;  %s2342_s8 = scalar_lea.hbm %s3014_s10, 256 }
 0x38c   : > { %p2339_p2 = scmp.ne.s32.totalorder %s2860_s12, %s2338_s25  ;;  %p2343_p10 = scmp.lt.u32.totalorder %s2860_s12, %s3014_s10 }
 0x38d   : > { %p2344_p11 = scmp.lt.u32.totalorder %s2342_s8, %s2338_s25  ;;  %p2346_p6 = scmp.lt.u32.totalorder %s2338_s25, %s2860_s12 }
 0x38e   : > { %p2340_p8 = pnand %p2339_p2, %p3054_p5 }
 0x38f   : > { %p2345_p1 = por %p2344_p11, %p2343_p10 }
 0x390   : > { %p2341_p4 = pneg %p2340_p8 }
 0x391   : > { %p2347_p7 = por %p2346_p6, %p2345_p1 }
 0x393   : > { %p2348_p9 = pnand %p2347_p7, %p2341_p4 }
 0x395   : > { %2351 = shalt.err (!%p2348_p9)
}
 0x396   : > { %1933 = dma.vmem_to_hbm [thread:$0]  (%p3054_p5), %s2864_s29, 128, %s2860_s12, %s2872_s0  }
 0x397   : > { %s3055_s2 = scalar_lea.vmem [#allocation11], %s2800_s17  ;;  %s1891_s3 = sshll.u32 %s2591_s27, 8 }
 0x398   : > { %s1494_s19 = sshll.u32 %s3055_s2, 4  ;;  %s3056_s30 = sld [smem:[#allocation30_spill]]  ;;  %s2899_s19 = int_to_ptr.vmem [resolvable:$true] %s1494_s19 }
 0x399   : > { %s1465_s18 = scalar_lea.sflag [#allocation4], %s2797_s1  ;;  %s2352_s4 = scalar_lea.vmem %s2899_s19, 128 }
 0x39a   : > { %p2353_p12 = scmp.ne.s32.totalorder %s2899_s19, %s2352_s4  ;;  %s2502_s12 = smov [#allocation11]  }
 0x39b   : > { %s2356_s29 = sshll.u32 %s2502_s12, 4  ;;  %s2357_s29 = int_to_ptr.vmem [resolvable:$false] %s2356_s29 }
 0x39c   : > { %p2354_p3 = pnand %p2353_p12, %p3054_p5  ;;  %s2358_s27 = scalar_lea.vmem %s2357_s29, 256 }
 0x39d   : > { %p2359_p0 = scmp.lt.s32.totalorder %s2899_s19, %s2357_s29  ;;  %p2360_p2 = scmp.lt.s32.totalorder %s2358_s27, %s2352_s4 }
 0x39e   : > { %s2904_s8 = scalar_lea.hbm %s3056_s30, %s1891_s3  ;;  %p2355_p13 = pneg %p2354_p3 }
 0x39f   : > { %p2361_p8 = por %p2360_p2, %p2359_p0 }
 0x3a1   : > { %p2362_p4 = pnand %p2361_p8, %p2355_p13 }
 0x3a3   : > { %2365 = shalt.err (!%p2362_p4)
}
 0x3a4   : > { %s2366_s2 = scalar_lea.hbm %s2870_s15, 128  ;;  %s2370_s25 = scalar_lea.hbm %s3053_s11, 256 }
 0x3a5   : > { %p2367_p10 = scmp.ne.s32.totalorder %s2870_s15, %s2366_s2  ;;  %p2371_p6 = scmp.lt.u32.totalorder %s2870_s15, %s3053_s11 }
 0x3a6   : > { %p2372_p7 = scmp.lt.u32.totalorder %s2370_s25, %s2366_s2  ;;  %p2374_p12 = scmp.lt.u32.totalorder %s2366_s2, %s2870_s15 }
 0x3a7   : > { %p2368_p11 = pnand %p2367_p10, %p3054_p5 }
 0x3a8   : > { %p2373_p9 = por %p2372_p7, %p2371_p6 }
 0x3a9   : > { %p2369_p1 = pneg %p2368_p11 }
 0x3aa   : > { %p2375_p3 = por %p2374_p12, %p2373_p9 }
 0x3ac   : > { %p2376_p13 = pnand %p2375_p3, %p2369_p1 }
 0x3ae   : > { %2379 = shalt.err (!%p2376_p13)
}
 0x3af   : > { %1932 = dma.vmem_to_hbm [thread:$0]  (%p3054_p5), %s2899_s19, 128, %s2870_s15, %s1465_s18  }
 0x3b0   : > { %s2380_s4 = scalar_lea.vmem %s2850_s13, 256  ;;  %s2503_s27 = smov [#allocation14]  }
 0x3b1   : > { %p2381_p0 = scmp.ne.s32.totalorder %s2850_s13, %s2380_s4  ;;  %s2384_s3 = sshll.u32 %s2503_s27, 4  ;;  %s2385_s3 = int_to_ptr.vmem [resolvable:$false] %s2384_s3 }
 0x3b2   : > { %s2386_s2 = scalar_lea.vmem %s2385_s3, 512  ;;  %p2387_p4 = scmp.lt.s32.totalorder %s2850_s13, %s2385_s3 }
 0x3b3   : > { %p2382_p2 = pnand %p2381_p0, %p3054_p5  ;;  %p2388_p10 = scmp.lt.s32.totalorder %s2386_s2, %s2380_s4 }
 0x3b5   : > { %p2383_p8 = pneg %p2382_p2  ;;  %p2389_p11 = por %p2388_p10, %p2387_p4 }
 0x3b7   : > { %p2390_p1 = pnand %p2389_p11, %p2383_p8 }
 0x3b9   : > { %2393 = shalt.err (!%p2390_p1)
}
 0x3ba   : > { %s2394_s15 = scalar_lea.hbm %s2904_s8, 256  ;;  %s2398_s26 = scalar_lea.hbm %s3056_s30, 512 }
 0x3bb   : > { %p2395_p6 = scmp.ne.s32.totalorder %s2904_s8, %s2394_s15  ;;  %p2399_p12 = scmp.lt.u32.totalorder %s2904_s8, %s3056_s30 }
 0x3bc   : > { %p2400_p3 = scmp.lt.u32.totalorder %s2398_s26, %s2394_s15  ;;  %p2402_p0 = scmp.lt.u32.totalorder %s2394_s15, %s2904_s8 }
 0x3bd   : > { %p2396_p7 = pnand %p2395_p6, %p3054_p5 }
 0x3be   : > { %p2401_p13 = por %p2400_p3, %p2399_p12 }
 0x3bf   : > { %p2397_p9 = pneg %p2396_p7 }
 0x3c0   : > { %p2403_p2 = por %p2402_p0, %p2401_p13 }
 0x3c2   : > { %p2404_p8 = pnand %p2403_p2, %p2397_p9 }
 0x3c4   : > { %2407 = shalt.err (!%p2404_p8)
}
 0x3c5   : > { %1934 = dma.vmem_to_hbm [thread:$0]  (%p3054_p5), %s2850_s13, 256, %s2904_s8, %s2872_s0  }
 0x3c6   : > { %s3057_s27 = sld [smem:[#allocation28_spill]]  ;;  %s515_s3 = scalar_lea.vmem [#allocation15], %s2800_s17 }
 0x3c7   : > { %s1535_s2 = sshll.u32 %s515_s3, 4  ;;  %s3058_s18 = sld [smem:[#allocation31_spill]]  ;;  %s2960_s2 = int_to_ptr.vmem [resolvable:$true] %s1535_s2 }
 0x3c8   : > { %s1480_s0 = scalar_lea.sflag [#allocation16], %s2797_s1  ;;  %s2408_s13 = scalar_lea.vmem %s2960_s2, 128 }
 0x3c9   : > { %p2409_p4 = scmp.ne.s32.totalorder %s2960_s2, %s2408_s13  ;;  %s2504_s17 = smov [#allocation15]  }
 0x3ca   : > { %s2412_s8 = sshll.u32 %s2504_s17, 4  ;;  %s2413_s8 = int_to_ptr.vmem [resolvable:$false] %s2412_s8 }
 0x3cb   : > { %p2410_p10 = pnand %p2409_p4, %p3054_p5  ;;  %s2414_s25 = scalar_lea.vmem %s2413_s8, 256 }
 0x3cc   : > { %v1856_v33 = vld [vmem:[%s3057_s27] ss:$0 sm:$0xff]  ;;  %p2415_p1 = scmp.lt.s32.totalorder %s2960_s2, %s2413_s8  ;;  %p2416_p6 = scmp.lt.s32.totalorder %s2414_s25, %s2408_s13 }
 0x3cd   : > { %s2958_s26 = scalar_lea.hbm %s3058_s18, %s2854_s28  ;;  %p2411_p11 = pneg %p2410_p10 }
 0x3ce   : > { %p2417_p7 = por %p2416_p6, %p2415_p1 }
 0x3d0   : > { %p2418_p9 = pnand %p2417_p7, %p2411_p11 }
 0x45c   : > { %v1908_v32 = vpop.f32.mrb[4].mxu1 }
 0x45d   : > { %v1909_v34 = vpop.f32.mrb[5].mxu1 }
 0x45e   : > { %v1910_v35 = vadd.f32 %v1909_v34, %v1908_v32  ;;  %v1911_v36 = vpop.f32.mrb[6].mxu1 }
 0x45f   : > { %v1912_v37 = vpop.f32.mrb[7].mxu1 }
 0x460   : > { %v1458_v38 = vadd.f32 %v1910_v35, %v1856_v33 }
 0x462   : > { %1463 = vst [vmem:[%s515_s3] sm:$0xff] %v1458_v38 }
 0x463   : > { %2421 = shalt.err (!%p2418_p9)
}
 0x464   : > { %s2422_s1 = scalar_lea.hbm %s2958_s26, 128  ;;  %s2426_s29 = scalar_lea.hbm %s3058_s18, 256 }
 0x465   : > { %p2423_p12 = scmp.ne.s32.totalorder %s2958_s26, %s2422_s1  ;;  %p2427_p0 = scmp.lt.u32.totalorder %s2958_s26, %s3058_s18 }
 0x466   : > { %p2428_p2 = scmp.lt.u32.totalorder %s2426_s29, %s2422_s1  ;;  %p2430_p4 = scmp.lt.u32.totalorder %s2422_s1, %s2958_s26 }
 0x467   : > { %p2424_p3 = pnand %p2423_p12, %p3054_p5 }
 0x468   : > { %p2429_p8 = por %p2428_p2, %p2427_p0 }
 0x469   : > { %p2425_p13 = pneg %p2424_p3 }
 0x46a   : > { %p2431_p10 = por %p2430_p4, %p2429_p8 }
 0x46c   : > { %p2432_p11 = pnand %p2431_p10, %p2425_p13 }
 0x46e   : > { %2435 = shalt.err (!%p2432_p11)
}
 0x46f   : > { %1935 = dma.vmem_to_hbm [thread:$0]  (%p3054_p5), %s2960_s2, 128, %s2958_s26, %s1480_s0  }
 0x470 PF: > { %s1547_s3 = sand.u32 1, %s2478_s21   ;;  %p3059_p1 = scmp.ne.s32.totalorder %s3043_s16, 0 }
 0x471   : > { %p3060_p6 = scmp.ge.s32.totalorder %s2490_s24, 2  ;;  %s1548_s15 = scalar_lea.sflag [#allocation4], %s1547_s3 }
 0x473   : > { %p1958_p7 = pnand %p3060_p6, %p3059_p1 }
 0x475   : > { %2465 = dma.done.wait (!%p1958_p7), %s1548_s15, 128  }
 0x476   : > { %2467 = vsyncadd (!%p1958_p7), %s1548_s15, 4294967168  ;;  %s3061_s19 = sadd.s32 4294967294, %s2490_s24  }
 0x477   : > { %s1556_s13 = sand.u32 1, %s3061_s19  }
 0x478   : > { %s1557_s17 = scalar_lea.sflag [#allocation13], %s1556_s13 }
 0x479   : > { %2469 = dma.done.wait (!%p1958_p7), %s1557_s17, 384  }
 0x47a   : > { %2471 = vsyncadd (!%p1958_p7), %s1557_s17, 4294966912  ;;  %s1575_s14 = scalar_lea.sflag [#allocation16], %s1547_s3 }
 0x47b   : > { %2473 = dma.done.wait (!%p1958_p7), %s1575_s14, 128  }
 0x47c   : > { %2475 = vsyncadd (!%p1958_p7), %s1575_s14, 4294967168  ;;  %p34_p5 = scmp.ge.s32.totalorder %s2719_s9, 4   ;;  %s3062_s21 = smov %s2482_s22 }
 0x47d   : > { %s3063_s22 = smov %s2486_s23  ;;  %s3064_s23 = smov %s2730_s20 }
 0x47e   : > { %s3065_s24 = smov %s2719_s9  ;;  %36 = sbr.rel (!%p34_p5) target bundleno = 21 (0x15), region = 166 }
 0x485   :  { %1580 = vsyncpa [#allocation3], 1 }
 0x486   :  { %1582 = vsyncpa [#allocation3 + $0x1], 1 }
 0x487   :  { %1583 = vsyncpa [#allocation6], 1 }
 0x488   :  { %1584 = vsyncpa [#allocation9], 1 }
 0x489   :  { %1585 = vsyncpa [#allocation4], 1 }
 0x48a   :  { %1587 = vsyncpa [#allocation4 + $0x1], 1 }
 0x48b   :  { %1588 = vsyncpa [#allocation13], 1 }
 0x48c   :  { %1590 = vsyncpa [#allocation13 + $0x1], 1 }
 0x48d   :  { %1591 = vsyncpa [#allocation16], 1 }
 0x48e   :  { %1593 = vsyncpa [#allocation16 + $0x1], 1 }

// kernel: tpu_custom_call.1
= control target key start
LH: loop header
LB: loop body
LE: loop exit
PB: predicated region body
PF: predicated region fallthrough
CT: control target
= control target key end

     0   :  { %s3004_s0 = inlined_call_operand.hbm [shape: bf16[10,256], index: 0, kind: input, shape index: {}]   ;;  %s3005_s1 = inlined_call_operand.hbm [shape: bf16[256,256], index: 1, kind: input, shape index: {}]   ;;  %s3006_s2 = inlined_call_operand.vmem [shape: f32[1,256], index: 2, kind: input, shape index: {}]   ;;  %s3007_s3 = inlined_call_operand.hbm [shape: bf16[256,256], index: 3, kind: input, shape index: {}]   ;;  %s3008_s4 = inlined_call_operand.vmem [shape: f32[1,256], index: 4, kind: input, shape index: {}]   ;;  %s3009_s5 = inlined_call_operand.hbm [shape: bf16[256,256], index: 5, kind: input, shape index: {}]   ;;  %s3010_s6 = inlined_call_operand.vmem [shape: f32[1,256], index: 6, kind: input, shape index: {}]   ;;  %s3011_s7 = inlined_call_operand.hbm [shape: bf16[256,128], index: 7, kind: input, shape index: {}]   ;;  %s3012_s8 = inlined_call_operand.vmem [shape: f32[1,128], index: 8, kind: input, shape index: {}]   ;;  %s3013_s9 = inlined_call_operand.hbm [shape: bf16[10,256], index: 9, kind: output, shape index: {0}]   ;;  %s3014_s10 = inlined_call_operand.hbm [shape: bf16[10,256], index: 10, kind: output, shape index: {1}]   ;;  %s3015_s11 = inlined_call_operand.hbm [shape: f32[10,256], index: 11, kind: output, shape index: {2}]   ;;  %s3016_s12 = inlined_call_operand.hbm [shape: f32[10,128], index: 12, kind: output, shape index: {3}]  }
   0x1   :  { %3025 = sst [smem:[#allocation23_spill]] %s3004_s0 }
   0x2   :  { %3026 = sst [smem:[#allocation24_spill]] %s3005_s1 }
   0x3   :  { %3027 = sst [smem:[#allocation25_spill]] %s3006_s2 }
   0x4   :  { %3028 = sst [smem:[#allocation26_spill]] %s3007_s3 }
   0x5   :  { %3029 = sst [smem:[#allocation27_spill]] %s3008_s4 }
   0x6   :  { %3030 = sst [smem:[#allocation28_spill]] %s3012_s8 }
   0x7   :  { %3031 = sst [smem:[#allocation29_spill]] %s3013_s9 }
   0x8   :  { %3032 = sst [smem:[#allocation30_spill]] %s3015_s11 }
   0x9   :  { %3033 = sst [smem:[#allocation31_spill]] %s3016_s12 }
   0xa   :  { %18 = vsyncpa [#allocation3], 0 }
   0xb   :  { %20 = vsyncpa [#allocation3 + $0x1], 0 }
   0xc   :  { %21 = vsyncpa [#allocation6], 0 }
   0xd   :  { %22 = vsyncpa [#allocation9], 0 }
   0xe   :  { %23 = vsyncpa [#allocation4], 0 }
   0xf   :  { %25 = vsyncpa [#allocation4 + $0x1], 0 }
  0x10   :  { %26 = vsyncpa [#allocation13], 0 }
  0x11   :  { %28 = vsyncpa [#allocation13 + $0x1], 0 }
  0x12   :  { %29 = vsyncpa [#allocation16], 0 }
  0x13   :  { %31 = vsyncpa [#allocation16 + $0x1], 0  ;;  %s2570_s21 = smov 0   ;;  %s2572_s22 = smov 0  }
  0x14   :  { %s2574_s23 = smov 0   ;;  %s2576_s24 = smov 0  }
  0x15 LB: > { %s2492_s25 = smov [#allocation5]   ;;  %s2591_s27 = sadd.s32 4294967295, %s2490_s24   ;;  %s2490_s24 = sphi %s2576_s24, %s3065_s24   ;;  %s2486_s23 = sphi %s2574_s23, %s3064_s23   ;;  %s2482_s22 = sphi %s2572_s22, %s3063_s22   ;;  %s2478_s21 = sphi %s2570_s21, %s3062_s21  }
  0x16   : > { %s352_s26 = sshll.u32 %s2492_s25, 4  ;;  %p1737_p0 = scmp.ge.s32.totalorder %s2490_s24, 1  ;;  %s2596_s26 = int_to_ptr.vmem [resolvable:$true] %s352_s26 }
  0x17   : > { %p3020_p1 = scmp.eq.s32.totalorder %s2591_s27, 0  ;;  %p340_p2 = scmp.lt.s32.totalorder %s2490_s24, 3 }
  0x18   : > { %s2493_s29 = smov [#allocation8]   ;;  %s2494_s14 = smov [#allocation7]  }
  0x19   : > { %p2598_p3 = pnand %p1737_p0, %p340_p2  ;;  %s384_s30 = sshll.u32 %s2493_s29, 4  ;;  %s2611_s30 = int_to_ptr.vmem [resolvable:$true] %s384_s30 }
  0x1a   : > { %s368_s15 = sshll.u32 %s2494_s14, 4  ;;  %s3036_s1 = sld [smem:[#allocation24_spill]]  ;;  %s2613_s15 = int_to_ptr.vmem [resolvable:$true] %s368_s15 }
  0x1b   : > { %s3034_s28 = scalar_select %p2598_p3, 1, 0 }
  0x1c   : > { %p1940_p5 = pneg %p2598_p3 }
  0x1e   : > { %p2607_p6 = pnand %p1940_p5, %p3020_p1 }
  0x20   : > { %s2182_s18 = scalar_lea.hbm %s3036_s1, 4096  ;;  %p2623_p8 = pneg %p2607_p6 }
  0x21   : > { %p2183_p7 = scmp.ne.s32.totalorder %s3036_s1, %s2182_s18  ;;  %p2189_p11 = scmp.lt.u32.totalorder %s2182_s18, %s3036_s1 }
  0x23   : > { %p2185_p9 = pnand %p2623_p8, %p2183_p7 }
  0x25   : > { %p2186_p10 = pneg %p2185_p9 }
  0x27   : > { %p2191_p12 = pnand %p2189_p11, %p2186_p10 }
  0x29   : > { %2194 = shalt.err (!%p2191_p12)
}
  0x2a   : > { %s2195_s16 = scalar_lea.vmem %s2596_s26, 4096  ;;  %p2203_p5 = scmp.lt.s32.totalorder %s2596_s26, %s2596_s26 }
  0x2b   : > { %p2196_p13 = scmp.ne.s32.totalorder %s2596_s26, %s2195_s16  ;;  %p2204_p4 = scmp.lt.s32.totalorder %s2195_s16, %s2195_s16 }
  0x2d   : > { %p2198_p0 = pnand %p2196_p13, %p2623_p8  ;;  %p2205_p7 = por %p2204_p4, %p2203_p5 }
  0x2f   : > { %p2199_p2 = pneg %p2198_p0 }
  0x31   : > { %p2206_p9 = pnand %p2205_p7, %p2199_p2 }
  0x33   : > { %2209 = shalt.err (!%p2206_p9)
}
  0x34   : > { %s2495_s17 = smov 128   ;;  %s2496_s18 = smov 8  }
  0x35   : > { %1943 = dma.hbm_to_vmem [thread:$0]  (!%p2607_p6), %s3036_s1, 4096, %s2596_s26, [#allocation6], %s2495_s17, %s2495_s17, %s2496_s18  }
  0x36   : > { %s2210_s16 = scalar_lea.hbm %s3009_s5, 4096 }
  0x37   : > { %p2211_p4 = scmp.ne.s32.totalorder %s3009_s5, %s2210_s16  ;;  %p2217_p12 = scmp.lt.u32.totalorder %s2210_s16, %s3009_s5 }
  0x39   : > { %p2213_p10 = pnand %p2211_p4, %p2623_p8 }
  0x3b   : > { %p2214_p11 = pneg %p2213_p10 }
  0x3d   : > { %p2219_p13 = pnand %p2217_p12, %p2214_p11 }
  0x3f   : > { %2222 = shalt.err (!%p2219_p13)
}
  0x40   : > { %s2223_s26 = scalar_lea.vmem %s2611_s30, 4096  ;;  %p2231_p7 = scmp.lt.s32.totalorder %s2611_s30, %s2611_s30 }
  0x41   : > { %p2224_p0 = scmp.ne.s32.totalorder %s2611_s30, %s2223_s26  ;;  %p2232_p9 = scmp.lt.s32.totalorder %s2223_s26, %s2223_s26 }
  0x43   : > { %p2226_p2 = pnand %p2224_p0, %p2623_p8  ;;  %p2233_p4 = por %p2232_p9, %p2231_p7 }
  0x45   : > { %p2227_p5 = pneg %p2226_p2 }
  0x47   : > { %p2234_p10 = pnand %p2233_p4, %p2227_p5 }
  0x49   : > { %2237 = shalt.err (!%p2234_p10)
}
  0x4a   : > { %1949 = dma.hbm_to_vmem [thread:$0]  (!%p2607_p6), %s3009_s5, 4096, %s2611_s30, [#allocation9], %s2495_s17, %s2495_s17, %s2496_s18  }
  0x4b   : > { %s3038_s3 = sld [smem:[#allocation26_spill]] }
  0x51   : > { %s2238_s19 = scalar_lea.hbm %s3038_s3, 4096 }
  0x52   : > { %p2239_p11 = scmp.ne.s32.totalorder %s3038_s3, %s2238_s19  ;;  %p2245_p0 = scmp.lt.u32.totalorder %s2238_s19, %s3038_s3 }
  0x54   : > { %p2241_p12 = pnand %p2239_p11, %p2623_p8 }
  0x56   : > { %p2242_p13 = pneg %p2241_p12 }
  0x58   : > { %p2247_p2 = pnand %p2245_p0, %p2242_p13 }
  0x5a   : > { %2250 = shalt.err (!%p2247_p2)
}
  0x5b   : > { %s2251_s30 = scalar_lea.vmem %s2613_s15, 4096  ;;  %p2259_p4 = scmp.lt.s32.totalorder %s2613_s15, %s2613_s15 }
  0x5c   : > { %p2252_p5 = scmp.ne.s32.totalorder %s2613_s15, %s2251_s30  ;;  %p2260_p10 = scmp.lt.s32.totalorder %s2251_s30, %s2251_s30 }
  0x5e   : > { %p2254_p7 = pnand %p2252_p5, %p2623_p8  ;;  %p2261_p11 = por %p2260_p10, %p2259_p4 }
  0x60   : > { %p2255_p9 = pneg %p2254_p7 }
  0x62   : > { %p2262_p12 = pnand %p2261_p11, %p2255_p9 }
  0x64   : > { %2265 = shalt.err (!%p2262_p12)
}
  0x65   : > { %1946 = dma.hbm_to_vmem [thread:$0]  (!%p2607_p6), %s3038_s3, 4096, %s2613_s15, [#allocation6], %s2495_s17, %s2495_s17, %s2496_s18  }
  0x66   : > { %s2497_s9 = smov [#allocation10]   ;;  %s2266_s20 = scalar_lea.hbm %s3011_s7, 2048 }
  0x67   : > { %s400_s11 = sshll.u32 %s2497_s9, 4  ;;  %p2267_p13 = scmp.ne.s32.totalorder %s3011_s7, %s2266_s20  ;;  %s401_s11 = int_to_ptr.vmem [resolvable:$true] %s400_s11 }
  0x68   : > { %p2273_p5 = scmp.lt.u32.totalorder %s2266_s20, %s3011_s7 }
  0x69   : > { %p2269_p0 = pnand %p2267_p13, %p2623_p8 }
  0x6b   : > { %p2270_p2 = pneg %p2269_p0 }
  0x6d   : > { %p2275_p7 = pnand %p2273_p5, %p2270_p2 }
  0x6f   : > { %2278 = shalt.err (!%p2275_p7)
}
  0x70   : > { %s2279_s15 = scalar_lea.vmem %s401_s11, 2048  ;;  %p2287_p11 = scmp.lt.s32.totalorder %s401_s11, %s401_s11 }
  0x71   : > { %p2280_p9 = scmp.ne.s32.totalorder %s401_s11, %s2279_s15  ;;  %p2288_p12 = scmp.lt.s32.totalorder %s2279_s15, %s2279_s15 }
  0x73   : > { %p2282_p4 = pnand %p2280_p9, %p2623_p8  ;;  %p2289_p1 = por %p2288_p12, %p2287_p11 }
  0x75   : > { %p2283_p10 = pneg %p2282_p4 }
  0x77   : > { %p2290_p3 = pnand %p2289_p1, %p2283_p10 }
  0x79   : > { %2293 = shalt.err (!%p2290_p3)
}
  0x7a   : > { %s2498_s17 = smov 64   ;;  %s2499_s25 = smov 4  }
  0x7b   : > { %1952 = dma.hbm_to_vmem [thread:$0]  (!%p2607_p6), %s3011_s7, 2048, %s401_s11, [#allocation9], %s2498_s17, %s2498_s17, %s2499_s25  }
  0x7c   : > { %s3022_s8 = sadd.s32 4294967294, %s2490_s24   ;;  %s2719_s9 = sadd.s32 1, %s2490_s24  }
  0x7d   : > { %s41_s12 = ssub.s32 %s2490_s24, %s2719_s9  ;;  %s44_s19 = sadd.s32 1, %s2486_s23 }
  0x7e   : > { %p42_p1 = scmp.eq.s32.totalorder %s41_s12, 0  ;;  %p51_p3 = scmp.ne.s32.totalorder %s2486_s23, %s2482_s22 }
  0x7f   : > { %p52_p8 = scmp.eq.s32.totalorder %s2490_s24, 0  ;;  %p57_p13 = scmp.ne.s32.totalorder %s2482_s22, %s2478_s21 }
  0x80   : > { %s2730_s20 = scalar_select %p42_p1, %s2486_s23, %s44_s19  }
  0x81   : > { %p2732_p0 = por %p52_p8, %p51_p3  ;;  %p3040_p2 = scmp.eq.s32.totalorder %s2591_s27, 0 }
  0x82   : > { %p249_p5 = scmp.eq.s32.totalorder %s2591_s27, 1  ;;  %p255_p7 = scmp.eq.s32.totalorder %s3022_s8, 1 }
  0x83   : > { %p2738_p6 = por %p3040_p2, %p57_p13  ;;  %p1974_p9 = scmp.lt.s32.totalorder %s2490_s24, 2 }
  0x84   : > { %s417_s29 = sand.u32 1, %s2486_s23   ;;  %p2747_p4 = por %p249_p5, %p51_p3 }
  0x85   : > { %p2751_p10 = por %p255_p7, %p57_p13  ;;  %s1743_s30 = sshll.u32 %s417_s29, 3 }
  0x86   : > { %s3042_s14 = scalar_select %p2747_p4, 1, 0 }
  0x87   : > { %s3043_s16 = scalar_select %p2751_p10, 1, 0 }
  0x88   : > { %s1886_s15 = sshll.u32 %s2490_s24, 7  ;;  %s3044_s0 = sld [smem:[#allocation23_spill]] }
  0x89   : > { %s421_s26 = scalar_lea.vmem [#allocation2], %s1743_s30  ;;  %p2765_p11 = pnand %p1974_p9, %p2732_p0 }
  0x8a   : > { %s429_s12 = sshll.u32 %s421_s26, 4  ;;  %s418_s8 = scalar_lea.sflag [#allocation3], %s417_s29  ;;  %s2761_s12 = int_to_ptr.vmem [resolvable:$true] %s429_s12 }
  0x8b   : > { %p2296_p1 = pneg %p2765_p11 }
  0x8e   : > { %s2759_s18 = scalar_lea.hbm %s3044_s0, %s1886_s15  ;;  %s2299_s17 = scalar_lea.hbm %s3044_s0, 256 }
  0x8f   : > { %s2294_s1 = scalar_lea.hbm %s2759_s18, 128  ;;  %p2300_p13 = scmp.lt.u32.totalorder %s2759_s18, %s3044_s0 }
  0x90   : > { %p2295_p12 = scmp.ne.s32.totalorder %s2759_s18, %s2294_s1  ;;  %p2301_p0 = scmp.lt.u32.totalorder %s2299_s17, %s2294_s1 }
  0x91   : > { %p2303_p5 = scmp.lt.u32.totalorder %s2294_s1, %s2759_s18 }
  0x92   : > { %p2297_p3 = pnand %p2296_p1, %p2295_p12  ;;  %p2302_p2 = por %p2301_p0, %p2300_p13 }
  0x94   : > { %p2298_p8 = pneg %p2297_p3  ;;  %p2304_p7 = por %p2303_p5, %p2302_p2 }
  0x96   : > { %p2305_p9 = pnand %p2304_p7, %p2298_p8 }
  0x98   : > { %2308 = shalt.err (!%p2305_p9)
}
  0x99   : > { %s2309_s29 = scalar_lea.vmem %s2761_s12, 128  ;;  %s2500_s26 = smov [#allocation2]  }
  0x9a   : > { %p2310_p12 = scmp.ne.s32.totalorder %s2761_s12, %s2309_s29  ;;  %s2314_s30 = sshll.u32 %s2500_s26, 4  ;;  %s2315_s30 = int_to_ptr.vmem [resolvable:$false] %s2314_s30 }
  0x9b   : > { %s2316_s15 = scalar_lea.vmem %s2315_s30, 256  ;;  %p2317_p4 = scmp.lt.s32.totalorder %s2761_s12, %s2315_s30 }
  0x9c   : > { %p2312_p3 = pnand %p2310_p12, %p2296_p1  ;;  %p2318_p13 = scmp.lt.s32.totalorder %s2316_s15, %s2309_s29 }
  0x9e   : > { %p2313_p10 = pneg %p2312_p3  ;;  %p2319_p0 = por %p2318_p13, %p2317_p4 }
  0xa0   : > { %p2320_p2 = pnand %p2319_p0, %p2313_p10 }
  0xa2   : > { %2323 = shalt.err (!%p2320_p2)
}
  0xa3   : > { %1956 = dma.hbm_to_vmem [thread:$0]  (!%p2765_p11), %s2759_s18, 128, %s2761_s12, %s418_s8  }
  0xa4   : > { %p3046_p8 = scmp.ne.s32.totalorder %s3034_s28, 0 }
  0xa5   : > { %s2797_s1 = sand.u32 (!%p3046_p8), 1, %s2482_s22  }
  0xa6   : > { %438 = sbr.rel (%p3046_p8) target bundleno = 1136 (0x470), region = 56  ;;  %s2800_s17 = sshll.u32 (!%p3046_p8), %s2797_s1, 3 }
  0xa7   : > { %s441_s13 = scalar_lea.sflag (!%p3046_p8), [#allocation3], %s2797_s1  ;;  %s444_s25 = scalar_lea.vmem (!%p3046_p8), [#allocation2], %s2800_s17 }
  0xad   : > { %2453 = dma.done.wait (%p2738_p6), %s441_s13, 128  }
  0xae   : > { %2455 = vsyncadd (%p2738_p6), %s441_s13, 4294967168  ;;  %p3047_p4 = scmp.eq.s32.totalorder %s2591_s27, 0 }
  0xb0   : > { %2457 = dma.done.wait (%p3047_p4), [#allocation6], 8192   ;;  %p3048_p10 = pmov %p3047_p4 }
  0xb1   : > { %p3049_p11 = pmov %p3047_p4 }
  0xb2   : > { %2459 = vsyncadd (%p3048_p10), [#allocation6], 4294959104 }
  0xb3   : > { %2461 = dma.done.wait (%p3049_p11), [#allocation9], 6144   ;;  %p3050_p1 = pmov %p3047_p4 }
  0xb4   : > { %v2020_v0 = vld [vmem:[#allocation5 + $0x4] ss:$8 sps:$4 sm:$0xff]   ;;  %v2022_v1 = vld [vmem:[#allocation5] ss:$8 sps:$4 sm:$0xff]   ;;  %v2023_v2 = vld [vmem:[#allocation5 + $0x14] ss:$8 sps:$4 sm:$0xff]  }
  0xb5   : > { %2463 = vsyncadd (%p3050_p1), [#allocation9], 4294961152  ;;  %729 = vmatprep.subr.bf16.mxu0 %v2020_v0  ;;  %v2025_v3 = vld [vmem:[#allocation5 + $0x10] ss:$8 sps:$4 sm:$0xff]   ;;  %v2026_v4 = vld [vmem:[#allocation5 + $0x24] ss:$8 sps:$4 sm:$0xff]  }
  0xb6   : > { %730 = vmatpush1.bf16.msra.mxu0 %v2022_v1  ;;  %v2028_v5 = vld [vmem:[#allocation5 + $0x20] ss:$8 sps:$4 sm:$0xff]   ;;  %v2029_v6 = vld [vmem:[#allocation5 + $0x34] ss:$8 sps:$4 sm:$0xff]   ;;  %v2031_v7 = vld [vmem:[#allocation5 + $0x30] ss:$8 sps:$4 sm:$0xff]  }
  0xb7   : > { %731 = vmatprep.subr.bf16.mxu0 %v2023_v2  ;;  %v2032_v8 = vld [vmem:[#allocation5 + $0x44] ss:$8 sps:$4 sm:$0xff]   ;;  %v2034_v9 = vld [vmem:[#allocation5 + $0x40] ss:$8 sps:$4 sm:$0xff]   ;;  %v2035_v10 = vld [vmem:[#allocation5 + $0x54] ss:$8 sps:$4 sm:$0xff]  }
  0xb8   : > { %v2037_v11 = vld [vmem:[#allocation5 + $0x50] ss:$8 sps:$4 sm:$0xff]   ;;  %v2038_v12 = vld [vmem:[#allocation5 + $0x64] ss:$8 sps:$4 sm:$0xff]   ;;  %v2040_v13 = vld [vmem:[#allocation5 + $0x60] ss:$8 sps:$4 sm:$0xff]  }
  0xb9   : > { %v2818_v14 = vld [vmem:[%s444_s25] sm:$0xff]  ;;  %v2070_v16 = vld [vmem:[#allocation7 + $0x4] ss:$8 sps:$4 sm:$0xff]   ;;  %v2072_v17 = vld [vmem:[#allocation7] ss:$8 sps:$4 sm:$0xff]   ;;  %s3051_s2 = sld [smem:[#allocation25_spill]] }
  0xba   : > { %732 = vmatpush1.bf16.msra.mxu0 %v2025_v3  ;;  %v1757_v15 = vcombine.high %v2818_v14, %v2818_v14  ;;  %v2073_v18 = vld [vmem:[#allocation7 + $0x14] ss:$8 sps:$4 sm:$0xff]   ;;  %985 = vmatprep.subr.bf16.mxu1 %v2070_v16  ;;  %v2043_v20 = vld [vmem:[#allocation5 + $0x70] ss:$8 sps:$4 sm:$0xff]   ;;  %v2076_v22 = vld [vmem:[#allocation7 + $0x24] ss:$8 sps:$4 sm:$0xff]   ;;  %v1756_v56 = vcombine.low %v2818_v14, %v2818_v14 }
  0xbb   : > { %733 = vmatprep.subr.bf16.mxu0 %v2026_v4  ;;  %v2041_v19 = vld [vmem:[#allocation5 + $0x74] ss:$8 sps:$4 sm:$0xff]   ;;  %986 = vmatpush1.bf16.msra.mxu1 %v2072_v17  ;;  %v2075_v21 = vld [vmem:[#allocation7 + $0x10] ss:$8 sps:$4 sm:$0xff]   ;;  %v2044_v23 = vld [vmem:[#allocation5 + $0x84] ss:$8 sps:$4 sm:$0xff]  }
  0xbc   : > { %761 = vmatprep.mubr.bf16.mxu0 %v1757_v15  ;;  %987 = vmatprep.subr.bf16.mxu1 %v2073_v18  ;;  %v2046_v24 = vld [vmem:[#allocation5 + $0x80] ss:$8 sps:$4 sm:$0xff]   ;;  %v2079_v26 = vld [vmem:[#allocation7 + $0x34] ss:$8 sps:$4 sm:$0xff]   ;;  %v2049_v28 = vld [vmem:[#allocation5 + $0x90] ss:$8 sps:$4 sm:$0xff]  }
  0xbd   : > { %v2078_v25 = vld [vmem:[#allocation7 + $0x20] ss:$8 sps:$4 sm:$0xff]   ;;  %v2047_v27 = vld [vmem:[#allocation5 + $0x94] ss:$8 sps:$4 sm:$0xff]   ;;  %v2081_v29 = vld [vmem:[#allocation7 + $0x30] ss:$8 sps:$4 sm:$0xff]  }
  0xbe   : > { %734 = vmatpush1.bf16.msra.mxu0 %v2028_v5  ;;  %v2082_v30 = vld [vmem:[#allocation7 + $0x44] ss:$8 sps:$4 sm:$0xff]   ;;  %v2052_v32 = vld [vmem:[#allocation5 + $0xa0] ss:$8 sps:$4 sm:$0xff]   ;;  %v2085_v34 = vld [vmem:[#allocation7 + $0x54] ss:$8 sps:$4 sm:$0xff]  }
  0xbf   : > { %735 = vmatprep.subr.bf16.mxu0 %v2029_v6  ;;  %988 = vmatpush1.bf16.msra.mxu1 %v2075_v21  ;;  %v2050_v31 = vld [vmem:[#allocation5 + $0xa4] ss:$8 sps:$4 sm:$0xff]   ;;  %v2084_v33 = vld [vmem:[#allocation7 + $0x40] ss:$8 sps:$4 sm:$0xff]   ;;  %v2053_v35 = vld [vmem:[#allocation5 + $0xb4] ss:$8 sps:$4 sm:$0xff]  }
  0xc0   : > { %989 = vmatprep.subr.bf16.mxu1 %v2076_v22  ;;  %v2087_v36 = vld [vmem:[#allocation7 + $0x50] ss:$8 sps:$4 sm:$0xff]   ;;  %v2088_v38 = vld [vmem:[#allocation7 + $0x64] ss:$8 sps:$4 sm:$0xff]   ;;  %v2090_v40 = vld [vmem:[#allocation7 + $0x60] ss:$8 sps:$4 sm:$0xff]  }
  0xc1   : > { %v2055_v37 = vld [vmem:[#allocation5 + $0xb0] ss:$8 sps:$4 sm:$0xff]   ;;  %v2056_v39 = vld [vmem:[#allocation5 + $0xc4] ss:$8 sps:$4 sm:$0xff]   ;;  %v2058_v41 = vld [vmem:[#allocation5 + $0xc0] ss:$8 sps:$4 sm:$0xff]  }
  0xc2   : > { %736 = vmatpush1.bf16.msra.mxu0 %v2031_v7  ;;  %v2091_v42 = vld [vmem:[#allocation7 + $0x74] ss:$8 sps:$4 sm:$0xff]   ;;  %v2093_v44 = vld [vmem:[#allocation7 + $0x70] ss:$8 sps:$4 sm:$0xff]   ;;  %v2094_v46 = vld [vmem:[#allocation7 + $0x84] ss:$8 sps:$4 sm:$0xff]  }
  0xc3   : > { %737 = vmatprep.subr.bf16.mxu0 %v2032_v8  ;;  %990 = vmatpush1.bf16.msra.mxu1 %v2078_v25  ;;  %v2059_v43 = vld [vmem:[#allocation5 + $0xd4] ss:$8 sps:$4 sm:$0xff]   ;;  %v2061_v45 = vld [vmem:[#allocation5 + $0xd0] ss:$8 sps:$4 sm:$0xff]   ;;  %v2062_v47 = vld [vmem:[#allocation5 + $0xe4] ss:$8 sps:$4 sm:$0xff]  }
  0xc4   : > { %991 = vmatprep.subr.bf16.mxu1 %v2079_v26  ;;  %v2096_v48 = vld [vmem:[#allocation7 + $0x80] ss:$8 sps:$4 sm:$0xff]   ;;  %v2097_v50 = vld [vmem:[#allocation7 + $0x94] ss:$8 sps:$4 sm:$0xff]   ;;  %v2099_v52 = vld [vmem:[#allocation7 + $0x90] ss:$8 sps:$4 sm:$0xff]  }
  0xc5   : > { %v2064_v49 = vld [vmem:[#allocation5 + $0xe0] ss:$8 sps:$4 sm:$0xff]   ;;  %v2065_v51 = vld [vmem:[#allocation5 + $0xf4] ss:$8 sps:$4 sm:$0xff]   ;;  %v2067_v53 = vld [vmem:[#allocation5 + $0xf0] ss:$8 sps:$4 sm:$0xff]  }
  0xc6   : > { %738 = vmatpush1.bf16.msra.mxu0 %v2034_v9  ;;  %v2100_v54 = vld [vmem:[#allocation7 + $0xa4] ss:$8 sps:$4 sm:$0xff]   ;;  %v2102_v55 = vld [vmem:[#allocation7 + $0xa0] ss:$8 sps:$4 sm:$0xff]   ;;  %v2103_v57 = vld [vmem:[#allocation7 + $0xb4] ss:$8 sps:$4 sm:$0xff]  }
  0xc7   : > { %739 = vmatprep.subr.bf16.mxu0 %v2035_v10  ;;  %992 = vmatpush1.bf16.msra.mxu1 %v2081_v29  ;;  %v2105_v58 = vld [vmem:[#allocation7 + $0xb0] ss:$8 sps:$4 sm:$0xff]   ;;  %v2106_v59 = vld [vmem:[#allocation7 + $0xc4] ss:$8 sps:$4 sm:$0xff]   ;;  %v2108_v60 = vld [vmem:[#allocation7 + $0xc0] ss:$8 sps:$4 sm:$0xff]  }
  0xc8   : > { %993 = vmatprep.subr.bf16.mxu1 %v2082_v30  ;;  %v2109_v61 = vld [vmem:[#allocation7 + $0xd4] ss:$8 sps:$4 sm:$0xff]   ;;  %v2111_v62 = vld [vmem:[#allocation7 + $0xd0] ss:$8 sps:$4 sm:$0xff]   ;;  %v2112_v63 = vld [vmem:[#allocation7 + $0xe4] ss:$8 sps:$4 sm:$0xff]  }
  0xc9   : > { %v2114_v0 = vld [vmem:[#allocation7 + $0xe0] ss:$8 sps:$4 sm:$0xff]   ;;  %v2115_v1 = vld [vmem:[#allocation7 + $0xf4] ss:$8 sps:$4 sm:$0xff]   ;;  %v2117_v2 = vld [vmem:[#allocation7 + $0xf0] ss:$8 sps:$4 sm:$0xff]  }
  0xca   : > { %740 = vmatpush1.bf16.msra.mxu0 %v2037_v11  ;;  %v2118_v3 = vld [vmem:[#allocation8] ss:$8 sps:$4 sm:$0xff]   ;;  %v2120_v4 = vld [vmem:[#allocation8 + $0x4] ss:$8 sps:$4 sm:$0xff]   ;;  %v2123_v5 = vld [vmem:[#allocation8 + $0x14] ss:$8 sps:$4 sm:$0xff]  }
  0xcb   : > { %741 = vmatprep.subr.bf16.mxu0 %v2038_v12  ;;  %994 = vmatpush1.bf16.msra.mxu1 %v2084_v33  ;;  %v2121_v6 = vld [vmem:[#allocation8 + $0x10] ss:$8 sps:$4 sm:$0xff]   ;;  %v2126_v7 = vld [vmem:[#allocation8 + $0x24] ss:$8 sps:$4 sm:$0xff]   ;;  %v2124_v8 = vld [vmem:[#allocation8 + $0x20] ss:$8 sps:$4 sm:$0xff]  }
  0xcc   : > { %995 = vmatprep.subr.bf16.mxu1 %v2085_v34  ;;  %v2129_v9 = vld [vmem:[#allocation8 + $0x34] ss:$8 sps:$4 sm:$0xff]   ;;  %v2127_v10 = vld [vmem:[#allocation8 + $0x30] ss:$8 sps:$4 sm:$0xff]   ;;  %v2132_v11 = vld [vmem:[#allocation8 + $0x44] ss:$8 sps:$4 sm:$0xff]  }
  0xcd   : > { %v2130_v12 = vld [vmem:[#allocation8 + $0x40] ss:$8 sps:$4 sm:$0xff]   ;;  %v2133_v14 = vld [vmem:[#allocation8 + $0x50] ss:$8 sps:$4 sm:$0xff]   ;;  %v2138_v15 = vld [vmem:[#allocation8 + $0x64] ss:$8 sps:$4 sm:$0xff]  }
  0xce   : > { %742 = vmatpush1.bf16.msra.mxu0 %v2040_v13  ;;  %v2135_v13 = vld [vmem:[#allocation8 + $0x54] ss:$8 sps:$4 sm:$0xff]   ;;  %v2136_v16 = vld [vmem:[#allocation8 + $0x60] ss:$8 sps:$4 sm:$0xff]   ;;  %v2139_v18 = vld [vmem:[#allocation8 + $0x70] ss:$8 sps:$4 sm:$0xff]  }
  0xcf   : > { %743 = vmatprep.subr.bf16.mxu0 %v2041_v19  ;;  %996 = vmatpush1.bf16.msra.mxu1 %v2087_v36  ;;  %v2141_v17 = vld [vmem:[#allocation8 + $0x74] ss:$8 sps:$4 sm:$0xff]   ;;  %v2144_v19 = vld [vmem:[#allocation8 + $0x84] ss:$8 sps:$4 sm:$0xff]   ;;  %v2145_v22 = vld [vmem:[#allocation8 + $0x90] ss:$8 sps:$4 sm:$0xff]  }
  0xd0   : > { %997 = vmatprep.subr.bf16.mxu1 %v2088_v38  ;;  %v2147_v21 = vld [vmem:[#allocation8 + $0x94] ss:$8 sps:$4 sm:$0xff]   ;;  %v2151_v26 = vld [vmem:[#allocation8 + $0xb0] ss:$8 sps:$4 sm:$0xff]   ;;  %s3024_s11 = scalar_lea.vmem [#allocation11], %s2800_s17  ;;  %s3052_s4 = sld [smem:[#allocation27_spill]] }
  0xd1   : > { %v2153_v25 = vld [vmem:[#allocation8 + $0xb4] ss:$8 sps:$4 sm:$0xff]   ;;  %v2157_v30 = vld [vmem:[#allocation8 + $0xd0] ss:$8 sps:$4 sm:$0xff]   ;;  %s501_s19 = scalar_lea.vmem [#allocation12], %s2800_s17  ;;  %s1754_s30 = sshll.u32 %s2797_s1, 4 }
  0xd2   : > { %744 = vmatpush1.bf16.msra.mxu0 %v2043_v20  ;;  %v2142_v20 = vld [vmem:[#allocation8 + $0x80] ss:$8 sps:$4 sm:$0xff]   ;;  %v2159_v29 = vld [vmem:[#allocation8 + $0xd4] ss:$8 sps:$4 sm:$0xff]   ;;  %v550_v34 = vld [vmem:[%s3051_s2] sm:$0x3] }
  0xd3   : > { %745 = vmatprep.subr.bf16.mxu0 %v2044_v23  ;;  %998 = vmatpush1.bf16.msra.mxu1 %v2090_v40  ;;  %v2150_v23 = vld [vmem:[#allocation8 + $0xa4] ss:$8 sps:$4 sm:$0xff]   ;;  %s508_s15 = scalar_lea.vmem [#allocation14], %s1754_s30  ;;  %s1469_s25 = sand.u32 1, %s2591_s27  }
  0xd4   : > { %999 = vmatprep.subr.bf16.mxu1 %v2091_v42  ;;  %s1522_s13 = sshll.u32 %s508_s15, 4  ;;  %s2854_s28 = sshll.u32 %s2591_s27, 7  ;;  %s2850_s13 = int_to_ptr.vmem [resolvable:$true] %s1522_s13 }
  0xd5   : > { %s2860_s12 = scalar_lea.hbm %s3014_s10, %s2854_s28  ;;  %s1508_s29 = sshll.u32 %s501_s19, 4  ;;  %s2864_s29 = int_to_ptr.vmem [resolvable:$true] %s1508_s29 }
  0xd6   : > { %746 = vmatpush1.bf16.msra.mxu0 %v2046_v24  ;;  %v2148_v24 = vld [vmem:[#allocation8 + $0xa0] ss:$8 sps:$4 sm:$0xff]   ;;  %s2872_s0 = scalar_lea.sflag [#allocation13], %s1469_s25  ;;  %s2324_s2 = scalar_lea.vmem %s2864_s29, 128 }
  0xd7   : > { %747 = vmatprep.subr.bf16.mxu0 %v2047_v27  ;;  %1000 = vmatpush1.bf16.msra.mxu1 %v2093_v44  ;;  %v2156_v27 = vld [vmem:[#allocation8 + $0xc4] ss:$8 sps:$4 sm:$0xff]   ;;  %p2325_p6 = scmp.ne.s32.totalorder %s2864_s29, %s2324_s2  ;;  %p3054_p5 = scmp.ne.s32.totalorder %s3042_s14, 0 }
  0xd8   : > { %1001 = vmatprep.subr.bf16.mxu1 %v2094_v46  ;;  %s2501_s8 = smov [#allocation12]  }
  0xd9   : > { %p2326_p7 = pnand %p2325_p6, %p3054_p5  ;;  %s2328_s18 = sshll.u32 %s2501_s8, 4  ;;  %s2329_s18 = int_to_ptr.vmem [resolvable:$false] %s2328_s18 }
  0xda   : > { %748 = vmatpush1.bf16.msra.mxu0 %v2049_v28  ;;  %v2154_v28 = vld [vmem:[#allocation8 + $0xc0] ss:$8 sps:$4 sm:$0xff]   ;;  %p2331_p12 = scmp.lt.s32.totalorder %s2864_s29, %s2329_s18 }
  0xdb   : > { %749 = vmatprep.subr.bf16.mxu0 %v2050_v31  ;;  %1002 = vmatpush1.bf16.msra.mxu1 %v2096_v48  ;;  %v552_v31 = vlaneseq  ;;  %p2327_p9 = pneg %p2326_p7 }
  0xdc   : > { %1003 = vmatprep.subr.bf16.mxu1 %v2097_v50  ;;  %v2160_v50 = vld [vmem:[#allocation8 + $0xe0] ss:$8 sps:$4 sm:$0xff]  }
  0xde   : > { %750 = vmatpush1.bf16.msra.mxu0 %v2052_v32  ;;  %v553_v32 = vshrl.u32 %v552_v31, 7 }
  0xdf   : > { %751 = vmatprep.subr.bf16.mxu0 %v2053_v35  ;;  %1004 = vmatpush1.bf16.msra.mxu1 %v2099_v52  ;;  %v2163_v52 = vld [vmem:[#allocation8 + $0xf0] ss:$8 sps:$4 sm:$0xff]  }
  0xe0   : > { %1005 = vmatprep.subr.bf16.mxu1 %v2100_v54  ;;  %v2824_v33 = vsub.s32 0, %v553_v32  ;;  %v2829_v35 = vsub.s32 1, %v553_v32  ;;  %v2167_v54 = vld [vmem:[#allocation10] sm:$0xff]  }
  0xe2   : > { %752 = vmatpush1.bf16.msra.mxu0 %v2055_v37  ;;  %v555_v36 = vrot.slane %v550_v34, %v2824_v33  ;;  %v559_v37 = vrot.slane %v550_v34, %v2829_v35 }
  0xe3   : > { %753 = vmatprep.subr.bf16.mxu0 %v2056_v39  ;;  %1006 = vmatpush1.bf16.msra.mxu1 %v2102_v55  ;;  %v2168_v55 = vld [vmem:[#allocation10 + $0x48] sm:$0xff]  }
  0xe4   : > { %1007 = vmatprep.subr.bf16.mxu1 %v2103_v57  ;;  %v2170_v57 = vld [vmem:[#allocation10 + $0x50] sm:$0xff]  }
  0xe6   : > { %754 = vmatpush1.bf16.msra.mxu0 %v2058_v41 }
  0xe7   : > { %755 = vmatprep.subr.bf16.mxu0 %v2059_v43  ;;  %1008 = vmatpush1.bf16.msra.mxu1 %v2105_v58  ;;  %v2171_v58 = vld [vmem:[#allocation10 + $0x10] sm:$0xff]  }
  0xe8   : > { %1009 = vmatprep.subr.bf16.mxu1 %v2106_v59  ;;  %v2172_v59 = vld [vmem:[#allocation10 + $0x58] sm:$0xff]  }
  0xea   : > { %756 = vmatpush1.bf16.msra.mxu0 %v2061_v45 }
  0xeb   : > { %757 = vmatprep.subr.bf16.mxu0 %v2062_v47  ;;  %1010 = vmatpush1.bf16.msra.mxu1 %v2108_v60  ;;  %v2173_v60 = vld [vmem:[#allocation10 + $0x18] sm:$0xff]  }
  0xec   : > { %1011 = vmatprep.subr.bf16.mxu1 %v2109_v61  ;;  %v2174_v61 = vld [vmem:[#allocation10 + $0x60] sm:$0xff]  }
  0xee   : > { %758 = vmatpush1.bf16.msra.mxu0 %v2064_v49  ;;  %v2162_v49 = vld [vmem:[#allocation8 + $0xe4] ss:$8 sps:$4 sm:$0xff]  }
  0xef   : > { %759 = vmatprep.subr.bf16.mxu0 %v2065_v51  ;;  %1012 = vmatpush1.bf16.msra.mxu1 %v2111_v62  ;;  %v2165_v51 = vld [vmem:[#allocation8 + $0xf4] ss:$8 sps:$4 sm:$0xff]   ;;  %v2175_v62 = vld [vmem:[#allocation10 + $0x20] sm:$0xff]  }
  0xf0   : > { %1013 = vmatprep.subr.bf16.mxu1 %v2112_v63  ;;  %v2176_v63 = vld [vmem:[#allocation10 + $0x68] sm:$0xff]  }
  0xf2   : > { %760 = vmatpush1.bf16.msra.mxu0 %v2067_v53  ;;  %v2166_v53 = vld [vmem:[#allocation10 + $0x40] sm:$0xff]  }
  0xf3   : > { %1014 = vmatpush1.bf16.msra.mxu1 %v2114_v0  ;;  %1241 = vmatprep.subr.bf16.mxu0 %v2120_v4  ;;  %v2177_v0 = vld [vmem:[#allocation10 + $0x28] sm:$0xff]  }
  0xf4   : > { %1015 = vmatprep.subr.bf16.mxu1 %v2115_v1  ;;  %v813_v1 = vld [vmem:[%s3052_s4] sm:$0x3] }
  0xf5   : > { %762 = vmatmul.mubr.bf16.vlgmr.msra.gmra.mrb[0].mxu0 %v1756_v56  ;;  %v2169_v56 = vld [vmem:[#allocation10 + $0x8] sm:$0xff]  }
  0xf6   : > { %1242 = vmatpush1.bf16.msra.mxu0 %v2118_v3  ;;  %v822_v3 = vrot.slane %v813_v1, %v2829_v35 }
  0xf7   : > { %1016 = vmatpush1.bf16.msra.mxu1 %v2117_v2  ;;  %1243 = vmatprep.subr.bf16.mxu0 %v2123_v5  ;;  %v818_v2 = vrot.slane %v813_v1, %v2824_v33 }
  0xf8   : > { %1892 = vmatprep.subr.bf16.mxu1 %v2166_v53 }
  0xfa   : > { %1244 = vmatpush1.bf16.msra.mxu0 %v2121_v6 }
  0xfb   : > { %1245 = vmatprep.subr.bf16.mxu0 %v2126_v7 }
  0xfe   : > { %1246 = vmatpush1.bf16.msra.mxu0 %v2124_v8 }
  0xff   : > { %1247 = vmatprep.subr.bf16.mxu0 %v2129_v9 }
 0x102   : > { %1248 = vmatpush1.bf16.msra.mxu0 %v2127_v10 }
 0x103   : > { %1249 = vmatprep.subr.bf16.mxu0 %v2132_v11 }
 0x106   : > { %1250 = vmatpush1.bf16.msra.mxu0 %v2130_v12 }
 0x107   : > { %1251 = vmatprep.subr.bf16.mxu0 %v2135_v13 }
 0x10a   : > { %1252 = vmatpush1.bf16.msra.mxu0 %v2133_v14 }
 0x10b   : > { %1253 = vmatprep.subr.bf16.mxu0 %v2138_v15  ;;  %v2178_v15 = vld [vmem:[#allocation10 + $0x70] sm:$0xff]  }
 0x10e   : > { %1254 = vmatpush1.bf16.msra.mxu0 %v2136_v16  ;;  %v2179_v16 = vld [vmem:[#allocation10 + $0x30] sm:$0xff]  }
 0x10f   : > { %1255 = vmatprep.subr.bf16.mxu0 %v2141_v17  ;;  %v2180_v17 = vld [vmem:[#allocation10 + $0x78] sm:$0xff]  }
 0x112   : > { %1256 = vmatpush1.bf16.msra.mxu0 %v2139_v18  ;;  %v2181_v18 = vld [vmem:[#allocation10 + $0x38] sm:$0xff]  }
 0x113   : > { %1257 = vmatprep.subr.bf16.mxu0 %v2144_v19  ;;  %v1069_v19 = vld [vmem:[%s3010_s6] sm:$0x3] }
 0x116   : > { %1258 = vmatpush1.bf16.msra.mxu0 %v2142_v20  ;;  %v1074_v20 = vrot.slane %v1069_v19, %v2824_v33 }
 0x117   : > { %1259 = vmatprep.subr.bf16.mxu0 %v2147_v21  ;;  %v1078_v21 = vrot.slane %v1069_v19, %v2829_v35 }
 0x11a   : > { %1260 = vmatpush1.bf16.msra.mxu0 %v2145_v22 }
 0x11b   : > { %1261 = vmatprep.subr.bf16.mxu0 %v2150_v23 }
 0x11e   : > { %1262 = vmatpush1.bf16.msra.mxu0 %v2148_v24 }
 0x11f   : > { %1263 = vmatprep.subr.bf16.mxu0 %v2153_v25 }
 0x122   : > { %1264 = vmatpush1.bf16.msra.mxu0 %v2151_v26 }
 0x123   : > { %1265 = vmatprep.subr.bf16.mxu0 %v2156_v27 }
 0x126   : > { %1266 = vmatpush1.bf16.msra.mxu0 %v2154_v28 }
 0x127   : > { %1267 = vmatprep.subr.bf16.mxu0 %v2159_v29 }
 0x12a   : > { %1268 = vmatpush1.bf16.msra.mxu0 %v2157_v30 }
 0x12b   : > { %1269 = vmatprep.subr.bf16.mxu0 %v2162_v49 }
 0x12e   : > { %1270 = vmatpush1.bf16.msra.mxu0 %v2160_v50 }
 0x12f   : > { %1271 = vmatprep.subr.bf16.mxu0 %v2165_v51 }
 0x132   : > { %1272 = vmatpush1.bf16.msra.mxu0 %v2163_v52 }
 0x1c8   : > { %v763_v38 = vpop.f32.mrb[0].mxu0 }
 0x1c9   : > { %v764_v39 = vadd.f32 %v763_v38, %v555_v36  ;;  %v765_v40 = vpop.f32.mrb[1].mxu0 }
 0x1ca   : > { %v766_v41 = vadd.f32 %v765_v40, %v559_v37  ;;  %v767_v42 = vpop.f32.mrb[2].mxu0 }
 0x1cb   : > { %v770_v43 = vmax.f32 %v764_v39, 0.0  ;;  %v768_v44 = vpop.f32.mrb[3].mxu0 }
 0x1cc   : > { %v771_v45 = vmax.f32 %v766_v41, 0.0 }
 0x1cd   : > { %v772_v48 = vpack.c.bf16 %v770_v43, %v770_v43 }
 0x1ce   : > { %v1887_v46 = vpack.c.bf16 %v771_v45, %v770_v43  ;;  %v773_v47 = vpack.c.bf16 %v771_v45, %v771_v45 }
 0x1d0   : > { %1017 = vmatprep.mubr.bf16.mxu1 %v773_v47  ;;  %780 = vst [vmem:[%s3024_s11] sm:$0xff] %v1887_v46  ;;  %s3053_s11 = sld [smem:[#allocation29_spill]] }
 0x1d1   : > { %1018 = vmatmul.mubr.bf16.vlgmr.msra.gmra.mrb[0].mxu1 %v772_v48 }
 0x1d2   : > { %1893 = vmatpush3.bf16.msra.mxu1 %v2167_v54 }
 0x1d3   : > { %1894 = vmatprep.subr.bf16.mxu1 %v2168_v55 }
 0x1d6   : > { %1895 = vmatpush3.bf16.msra.mxu1 %v2169_v56 }
 0x1d7   : > { %1896 = vmatprep.subr.bf16.mxu1 %v2170_v57 }
 0x1da   : > { %1897 = vmatpush3.bf16.msra.mxu1 %v2171_v58 }
 0x1db   : > { %1898 = vmatprep.subr.bf16.mxu1 %v2172_v59 }
 0x1de   : > { %1899 = vmatpush3.bf16.msra.mxu1 %v2173_v60 }
 0x1df   : > { %1900 = vmatprep.subr.bf16.mxu1 %v2174_v61 }
 0x1e2   : > { %1901 = vmatpush3.bf16.msra.mxu1 %v2175_v62 }
 0x1e3   : > { %1902 = vmatprep.subr.bf16.mxu1 %v2176_v63 }
 0x1e6   : > { %1903 = vmatpush3.bf16.msra.mxu1 %v2177_v0 }
 0x1e7   : > { %1904 = vmatprep.subr.bf16.mxu1 %v2178_v15 }
 0x1ea   : > { %1905 = vmatpush3.bf16.msra.mxu1 %v2179_v16 }
 0x1eb   : > { %1906 = vmatprep.subr.bf16.mxu1 %v2180_v17 }
 0x1ee   : > { %1907 = vmatpush3.bf16.msra.mxu1 %v2181_v18 }
 0x2a4   : > { %v1019_v4 = vpop.f32.mrb[0].mxu1 }
 0x2a5   : > { %v1020_v5 = vadd.f32 %v1019_v4, %v818_v2  ;;  %v1021_v6 = vpop.f32.mrb[1].mxu1 }
 0x2a6   : > { %v1022_v7 = vadd.f32 %v1021_v6, %v822_v3  ;;  %v1023_v8 = vpop.f32.mrb[2].mxu1 }
 0x2a7   : > { %v1026_v9 = vmax.f32 %v1020_v5, 0.0  ;;  %v1024_v10 = vpop.f32.mrb[3].mxu1 }
 0x2a8   : > { %v1027_v11 = vmax.f32 %v1022_v7, 0.0 }
 0x2a9   : > { %v1028_v14 = vpack.c.bf16 %v1026_v9, %v1026_v9 }
 0x2aa   : > { %v1029_v12 = vpack.c.bf16 %v1027_v11, %v1027_v11  ;;  %v1888_v13 = vpack.c.bf16 %v1027_v11, %v1026_v9 }
 0x2ac   : > { %1273 = vmatprep.mubr.bf16.mxu0 %v1029_v12  ;;  %1036 = vst [vmem:[%s501_s19] sm:$0xff] %v1888_v13  ;;  %s2330_s19 = scalar_lea.vmem %s2329_s18, 256 }
 0x2ad   : > { %1274 = vmatmul.mubr.bf16.vlgmr.msra.gmra.mrb[4].mxu0 %v1028_v14  ;;  %p2332_p3 = scmp.lt.s32.totalorder %s2330_s19, %s2324_s2 }
 0x2af   : > { %p2333_p13 = por %p2332_p3, %p2331_p12 }
 0x2b1   : > { %p2334_p0 = pnand %p2333_p13, %p2327_p9 }
 0x380   : > { %v1275_v22 = vpop.f32.mrb[4].mxu0 }
 0x381   : > { %v1276_v23 = vadd.f32 %v1275_v22, %v1074_v20  ;;  %v1277_v24 = vpop.f32.mrb[5].mxu0 }
 0x382   : > { %v1278_v25 = vadd.f32 %v1277_v24, %v1078_v21  ;;  %v1279_v26 = vpop.f32.mrb[6].mxu0 }
 0x383   : > { %v1282_v27 = vmax.f32 %v1276_v23, 0.0  ;;  %v1280_v28 = vpop.f32.mrb[7].mxu0 }
 0x384   : > { %v1283_v29 = vmax.f32 %v1278_v25, 0.0 }
 0x385   : > { %1284 = vst [vmem:[%s508_s15] sm:$0xff] %v1282_v27  ;;  %v1286_v31 = vpack.c.bf16 %v1282_v27, %v1282_v27 }
 0x386   : > { %1285 = vst [vmem:[%s508_s15 + $0x8] sm:$0xff] %v1283_v29  ;;  %v1287_v30 = vpack.c.bf16 %v1283_v29, %v1283_v29  ;;  %s2870_s15 = scalar_lea.hbm %s3053_s11, %s2854_s28 }
 0x388   : > { %1455 = vmatprep.mubr.bf16.mxu1 %v1287_v30 }
 0x389   : > { %1456 = vmatmul.mubr.bf16.vlgmr.msra.gmra.mrb[4].mxu1 %v1286_v31 }
 0x38a   : > { %2337 = shalt.err (!%p2334_p0)
}
 0x38b   : > { %s2338_s25 = scalar_lea.hbm %s2860_s12, 128  ;;  %s2342_s8 = scalar_lea.hbm %s3014_s10, 256 }
 0x38c   : > { %p2339_p2 = scmp.ne.s32.totalorder %s2860_s12, %s2338_s25  ;;  %p2343_p10 = scmp.lt.u32.totalorder %s2860_s12, %s3014_s10 }
 0x38d   : > { %p2344_p11 = scmp.lt.u32.totalorder %s2342_s8, %s2338_s25  ;;  %p2346_p6 = scmp.lt.u32.totalorder %s2338_s25, %s2860_s12 }
 0x38e   : > { %p2340_p8 = pnand %p2339_p2, %p3054_p5 }
 0x38f   : > { %p2345_p1 = por %p2344_p11, %p2343_p10 }
 0x390   : > { %p2341_p4 = pneg %p2340_p8 }
 0x391   : > { %p2347_p7 = por %p2346_p6, %p2345_p1 }
 0x393   : > { %p2348_p9 = pnand %p2347_p7, %p2341_p4 }
 0x395   : > { %2351 = shalt.err (!%p2348_p9)
}
 0x396   : > { %1933 = dma.vmem_to_hbm [thread:$0]  (%p3054_p5), %s2864_s29, 128, %s2860_s12, %s2872_s0  }
 0x397   : > { %s3055_s2 = scalar_lea.vmem [#allocation11], %s2800_s17  ;;  %s1891_s3 = sshll.u32 %s2591_s27, 8 }
 0x398   : > { %s1494_s19 = sshll.u32 %s3055_s2, 4  ;;  %s3056_s30 = sld [smem:[#allocation30_spill]]  ;;  %s2899_s19 = int_to_ptr.vmem [resolvable:$true] %s1494_s19 }
 0x399   : > { %s1465_s18 = scalar_lea.sflag [#allocation4], %s2797_s1  ;;  %s2352_s4 = scalar_lea.vmem %s2899_s19, 128 }
 0x39a   : > { %p2353_p12 = scmp.ne.s32.totalorder %s2899_s19, %s2352_s4  ;;  %s2502_s12 = smov [#allocation11]  }
 0x39b   : > { %s2356_s29 = sshll.u32 %s2502_s12, 4  ;;  %s2357_s29 = int_to_ptr.vmem [resolvable:$false] %s2356_s29 }
 0x39c   : > { %p2354_p3 = pnand %p2353_p12, %p3054_p5  ;;  %s2358_s27 = scalar_lea.vmem %s2357_s29, 256 }
 0x39d   : > { %p2359_p0 = scmp.lt.s32.totalorder %s2899_s19, %s2357_s29  ;;  %p2360_p2 = scmp.lt.s32.totalorder %s2358_s27, %s2352_s4 }
 0x39e   : > { %s2904_s8 = scalar_lea.hbm %s3056_s30, %s1891_s3  ;;  %p2355_p13 = pneg %p2354_p3 }
 0x39f   : > { %p2361_p8 = por %p2360_p2, %p2359_p0 }
 0x3a1   : > { %p2362_p4 = pnand %p2361_p8, %p2355_p13 }
 0x3a3   : > { %2365 = shalt.err (!%p2362_p4)
}
 0x3a4   : > { %s2366_s2 = scalar_lea.hbm %s2870_s15, 128  ;;  %s2370_s25 = scalar_lea.hbm %s3053_s11, 256 }
 0x3a5   : > { %p2367_p10 = scmp.ne.s32.totalorder %s2870_s15, %s2366_s2  ;;  %p2371_p6 = scmp.lt.u32.totalorder %s2870_s15, %s3053_s11 }
 0x3a6   : > { %p2372_p7 = scmp.lt.u32.totalorder %s2370_s25, %s2366_s2  ;;  %p2374_p12 = scmp.lt.u32.totalorder %s2366_s2, %s2870_s15 }
 0x3a7   : > { %p2368_p11 = pnand %p2367_p10, %p3054_p5 }
 0x3a8   : > { %p2373_p9 = por %p2372_p7, %p2371_p6 }
 0x3a9   : > { %p2369_p1 = pneg %p2368_p11 }
 0x3aa   : > { %p2375_p3 = por %p2374_p12, %p2373_p9 }
 0x3ac   : > { %p2376_p13 = pnand %p2375_p3, %p2369_p1 }
 0x3ae   : > { %2379 = shalt.err (!%p2376_p13)
}
 0x3af   : > { %1932 = dma.vmem_to_hbm [thread:$0]  (%p3054_p5), %s2899_s19, 128, %s2870_s15, %s1465_s18  }
 0x3b0   : > { %s2380_s4 = scalar_lea.vmem %s2850_s13, 256  ;;  %s2503_s27 = smov [#allocation14]  }
 0x3b1   : > { %p2381_p0 = scmp.ne.s32.totalorder %s2850_s13, %s2380_s4  ;;  %s2384_s3 = sshll.u32 %s2503_s27, 4  ;;  %s2385_s3 = int_to_ptr.vmem [resolvable:$false] %s2384_s3 }
 0x3b2   : > { %s2386_s2 = scalar_lea.vmem %s2385_s3, 512  ;;  %p2387_p4 = scmp.lt.s32.totalorder %s2850_s13, %s2385_s3 }
 0x3b3   : > { %p2382_p2 = pnand %p2381_p0, %p3054_p5  ;;  %p2388_p10 = scmp.lt.s32.totalorder %s2386_s2, %s2380_s4 }
 0x3b5   : > { %p2383_p8 = pneg %p2382_p2  ;;  %p2389_p11 = por %p2388_p10, %p2387_p4 }
 0x3b7   : > { %p2390_p1 = pnand %p2389_p11, %p2383_p8 }
 0x3b9   : > { %2393 = shalt.err (!%p2390_p1)
}
 0x3ba   : > { %s2394_s15 = scalar_lea.hbm %s2904_s8, 256  ;;  %s2398_s26 = scalar_lea.hbm %s3056_s30, 512 }
 0x3bb   : > { %p2395_p6 = scmp.ne.s32.totalorder %s2904_s8, %s2394_s15  ;;  %p2399_p12 = scmp.lt.u32.totalorder %s2904_s8, %s3056_s30 }
 0x3bc   : > { %p2400_p3 = scmp.lt.u32.totalorder %s2398_s26, %s2394_s15  ;;  %p2402_p0 = scmp.lt.u32.totalorder %s2394_s15, %s2904_s8 }
 0x3bd   : > { %p2396_p7 = pnand %p2395_p6, %p3054_p5 }
 0x3be   : > { %p2401_p13 = por %p2400_p3, %p2399_p12 }
 0x3bf   : > { %p2397_p9 = pneg %p2396_p7 }
 0x3c0   : > { %p2403_p2 = por %p2402_p0, %p2401_p13 }
 0x3c2   : > { %p2404_p8 = pnand %p2403_p2, %p2397_p9 }
 0x3c4   : > { %2407 = shalt.err (!%p2404_p8)
}
 0x3c5   : > { %1934 = dma.vmem_to_hbm [thread:$0]  (%p3054_p5), %s2850_s13, 256, %s2904_s8, %s2872_s0  }
 0x3c6   : > { %s3057_s27 = sld [smem:[#allocation28_spill]]  ;;  %s515_s3 = scalar_lea.vmem [#allocation15], %s2800_s17 }
 0x3c7   : > { %s1535_s2 = sshll.u32 %s515_s3, 4  ;;  %s3058_s18 = sld [smem:[#allocation31_spill]]  ;;  %s2960_s2 = int_to_ptr.vmem [resolvable:$true] %s1535_s2 }
 0x3c8   : > { %s1480_s0 = scalar_lea.sflag [#allocation16], %s2797_s1  ;;  %s2408_s13 = scalar_lea.vmem %s2960_s2, 128 }
 0x3c9   : > { %p2409_p4 = scmp.ne.s32.totalorder %s2960_s2, %s2408_s13  ;;  %s2504_s17 = smov [#allocation15]  }
 0x3ca   : > { %s2412_s8 = sshll.u32 %s2504_s17, 4  ;;  %s2413_s8 = int_to_ptr.vmem [resolvable:$false] %s2412_s8 }
 0x3cb   : > { %p2410_p10 = pnand %p2409_p4, %p3054_p5  ;;  %s2414_s25 = scalar_lea.vmem %s2413_s8, 256 }
 0x3cc   : > { %v1856_v33 = vld [vmem:[%s3057_s27] ss:$0 sm:$0xff]  ;;  %p2415_p1 = scmp.lt.s32.totalorder %s2960_s2, %s2413_s8  ;;  %p2416_p6 = scmp.lt.s32.totalorder %s2414_s25, %s2408_s13 }
 0x3cd   : > { %s2958_s26 = scalar_lea.hbm %s3058_s18, %s2854_s28  ;;  %p2411_p11 = pneg %p2410_p10 }
 0x3ce   : > { %p2417_p7 = por %p2416_p6, %p2415_p1 }
 0x3d0   : > { %p2418_p9 = pnand %p2417_p7, %p2411_p11 }
 0x45c   : > { %v1908_v32 = vpop.f32.mrb[4].mxu1 }
 0x45d   : > { %v1909_v34 = vpop.f32.mrb[5].mxu1 }
 0x45e   : > { %v1910_v35 = vadd.f32 %v1909_v34, %v1908_v32  ;;  %v1911_v36 = vpop.f32.mrb[6].mxu1 }
 0x45f   : > { %v1912_v37 = vpop.f32.mrb[7].mxu1 }
 0x460   : > { %v1458_v38 = vadd.f32 %v1910_v35, %v1856_v33 }
 0x462   : > { %1463 = vst [vmem:[%s515_s3] sm:$0xff] %v1458_v38 }
 0x463   : > { %2421 = shalt.err (!%p2418_p9)
}
 0x464   : > { %s2422_s1 = scalar_lea.hbm %s2958_s26, 128  ;;  %s2426_s29 = scalar_lea.hbm %s3058_s18, 256 }
 0x465   : > { %p2423_p12 = scmp.ne.s32.totalorder %s2958_s26, %s2422_s1  ;;  %p2427_p0 = scmp.lt.u32.totalorder %s2958_s26, %s3058_s18 }
 0x466   : > { %p2428_p2 = scmp.lt.u32.totalorder %s2426_s29, %s2422_s1  ;;  %p2430_p4 = scmp.lt.u32.totalorder %s2422_s1, %s2958_s26 }
 0x467   : > { %p2424_p3 = pnand %p2423_p12, %p3054_p5 }
 0x468   : > { %p2429_p8 = por %p2428_p2, %p2427_p0 }
 0x469   : > { %p2425_p13 = pneg %p2424_p3 }
 0x46a   : > { %p2431_p10 = por %p2430_p4, %p2429_p8 }
 0x46c   : > { %p2432_p11 = pnand %p2431_p10, %p2425_p13 }
 0x46e   : > { %2435 = shalt.err (!%p2432_p11)
}
 0x46f   : > { %1935 = dma.vmem_to_hbm [thread:$0]  (%p3054_p5), %s2960_s2, 128, %s2958_s26, %s1480_s0  }
 0x470 PF: > { %s1547_s3 = sand.u32 1, %s2478_s21   ;;  %p3059_p1 = scmp.ne.s32.totalorder %s3043_s16, 0 }
 0x471   : > { %p3060_p6 = scmp.ge.s32.totalorder %s2490_s24, 2  ;;  %s1548_s15 = scalar_lea.sflag [#allocation4], %s1547_s3 }
 0x473   : > { %p1958_p7 = pnand %p3060_p6, %p3059_p1 }
 0x475   : > { %2465 = dma.done.wait (!%p1958_p7), %s1548_s15, 128  }
 0x476   : > { %2467 = vsyncadd (!%p1958_p7), %s1548_s15, 4294967168  ;;  %s3061_s19 = sadd.s32 4294967294, %s2490_s24  }
 0x477   : > { %s1556_s13 = sand.u32 1, %s3061_s19  }
 0x478   : > { %s1557_s17 = scalar_lea.sflag [#allocation13], %s1556_s13 }
 0x479   : > { %2469 = dma.done.wait (!%p1958_p7), %s1557_s17, 384  }
 0x47a   : > { %2471 = vsyncadd (!%p1958_p7), %s1557_s17, 4294966912  ;;  %s1575_s14 = scalar_lea.sflag [#allocation16], %s1547_s3 }
 0x47b   : > { %2473 = dma.done.wait (!%p1958_p7), %s1575_s14, 128  }
 0x47c   : > { %2475 = vsyncadd (!%p1958_p7), %s1575_s14, 4294967168  ;;  %p34_p5 = scmp.ge.s32.totalorder %s2719_s9, 4   ;;  %s3062_s21 = smov %s2482_s22 }
 0x47d   : > { %s3063_s22 = smov %s2486_s23  ;;  %s3064_s23 = smov %s2730_s20 }
 0x47e   : > { %s3065_s24 = smov %s2719_s9  ;;  %36 = sbr.rel (!%p34_p5) target bundleno = 21 (0x15), region = 166 }
 0x485   :  { %1580 = vsyncpa [#allocation3], 1 }
 0x486   :  { %1582 = vsyncpa [#allocation3 + $0x1], 1 }
 0x487   :  { %1583 = vsyncpa [#allocation6], 1 }
 0x488   :  { %1584 = vsyncpa [#allocation9], 1 }
 0x489   :  { %1585 = vsyncpa [#allocation4], 1 }
 0x48a   :  { %1587 = vsyncpa [#allocation4 + $0x1], 1 }
 0x48b   :  { %1588 = vsyncpa [#allocation13], 1 }
 0x48c   :  { %1590 = vsyncpa [#allocation13 + $0x1], 1 }
 0x48d   :  { %1591 = vsyncpa [#allocation16], 1 }
 0x48e   :  { %1593 = vsyncpa [#allocation16 + $0x1], 1 }

</bundles_post_ra>
